<compile_context>
chip_gen: v6e
topology: v6e:2x2x1
jax: 0.10.0
libtpu: 0.0.40
codegen_flags: <defaults>
</compile_context>

<pallas_src>
import functools

import jax
import jax.numpy as jnp
from jax import lax
from jax.experimental import pallas as pl
from jax.experimental.pallas import tpu as pltpu


_VMEM_LIMIT = 48 * 1024 * 1024   # portable across v5e/v6e (128 MiB) and v7x (64 MiB)
_MAX_BLOCK_ROWS = 64             # target output-row tile for the conv M dimension
_MAX_COUT_TILE = 256             # N tile (256-aligned for the v6e/v7x 256x256 MXU)


def _round_up(x, m):
    return (x + m - 1) // m * m


def _largest_divisor_leq(n, cap):
    cap = max(1, min(n, cap))
    for d in range(cap, 0, -1):
        if n % d == 0:
            return d
    return 1


# ---------------------------------------------------------------------------
# Pallas kernel 1: fused 3x3 conv (pad=1, stride=1) + bias + ReLU
# ---------------------------------------------------------------------------
def _conv3x3_kernel(x_ref, w_ref, b_ref, o_ref, *, wp2, m_out):
    """One (row-block, cout-block) tile.

    x_ref: (1, m_in, Cin)   flat padded rows (row-major over (h+2, w+2)), bf16
    w_ref: (9, Cin, tn)     taps in (kh*3 + kw) order, bf16
    b_ref: (1, tn)          f32
    o_ref: (1, m_out, tn)   flat output rows (row-major over (th, w+2)), bf16

    Output flat position p = k*(w+2) + col holds output pixel (row k, col) for
    col < w; the 2 trailing columns per row are junk and sliced off outside.
    Tap (di, dj) of output position p reads input flat row p + di*(w+2) + dj,
    so every tap is a contiguous VMEM slice and one MXU matmul.
    """
    acc = jnp.zeros((m_out, o_ref.shape[-1]), jnp.float32)
    for di in range(3):
        for dj in range(3):
            off = di * wp2 + dj
            lhs = x_ref[0, off:off + m_out, :]            # (m_out, Cin) in VMEM
            acc += jnp.dot(lhs, w_ref[di * 3 + dj],
                           preferred_element_type=jnp.float32)
    o_ref[0] = jnp.maximum(acc + b_ref[...], 0.0).astype(o_ref.dtype)


def conv3x3_relu(x, w9, b2, *, max_block_rows=_MAX_BLOCK_ROWS):
    """x: (N, H, W, Cin) bf16; w9: (9, Cin, Cout) bf16; b2: (1, Cout) f32."""
    n, h, w, cin = x.shape
    cout = w9.shape[-1]

    # Pad Cin up to a multiple of 8 (zeros contribute nothing to the matmul).
    if cin % 8:
        cpad = _round_up(cin, 8)
        x = jnp.pad(x, ((0, 0), (0, 0), (0, 0), (0, cpad - cin)))
        w9 = jnp.pad(w9, ((0, 0), (0, cpad - cin), (0, 0)))
        cin = cpad

    wp2 = w + 2
    th = _largest_divisor_leq(h, max_block_rows)   # output rows per M tile
    nrb = h // th
    m_in = (th + 2) * wp2 + 2                      # halo'd flat rows per tile (+2 spare)
    m_out = th * wp2                               # flat output rows per tile

    tn = min(cout, _MAX_COUT_TILE)
    if cout % tn:
        tn = cout

    # Spatial zero-pad, flatten (h+2, w+2) row-major, add 2 spare rows so the
    # (2,2) tap of the last row block stays in bounds.
    xp = jnp.pad(x, ((0, 0), (1, 1), (1, 1), (0, 0)))
    xf = jnp.pad(xp.reshape(n, (h + 2) * wp2, cin), ((0, 0), (0, 2), (0, 0)))
    if nrb == 1:
        xb = xf                                    # already (n, m_in, cin)
    else:
        xb = jnp.stack(
            [xf[:, i * th * wp2: i * th * wp2 + m_in, :] for i in range(nrb)],
            axis=1).reshape(n * nrb, m_in, cin)

    out = pl.pallas_call(
        functools.partial(_conv3x3_kernel, wp2=wp2, m_out=m_out),
        out_shape=jax.ShapeDtypeStruct((n * nrb, m_out, cout), jnp.bfloat16),
        grid_spec=pltpu.PrefetchScalarGridSpec(
            num_scalar_prefetch=0,
            grid=(n * nrb, cout // tn),
            in_specs=[
                pl.BlockSpec((1, m_in, cin), lambda m, j: (m, 0, 0)),
                pl.BlockSpec((9, cin, tn), lambda m, j: (0, 0, j)),
                pl.BlockSpec((1, tn), lambda m, j: (0, j)),
            ],
            out_specs=pl.BlockSpec((1, m_out, tn), lambda m, j: (m, 0, j)),
        ),
        compiler_params=pltpu.CompilerParams(
            dimension_semantics=("parallel", "parallel"),
            vmem_limit_bytes=_VMEM_LIMIT),
    )(xb, w9, b2)

    # Drop the 2 junk columns per output row (the horizontal-pad tap outputs).
    out = out.reshape(n, nrb, th, wp2, cout)[:, :, :, :w, :]
    return out.reshape(n, h, w, cout)


# ---------------------------------------------------------------------------
# Pallas kernel 2: 2x2 / stride-2 max-pool, ceil_mode=True
#   The even/odd column split is done once outside the kernel (XLA strided
#   slice); the kernel itself only uses full slices + static integer indexing,
#   so it lowers under both Mosaic and interpret mode.
# ---------------------------------------------------------------------------
def _maxpool_kernel(xe_ref, xo_ref, o_ref):
    a = xe_ref[:, 0]        # (bm, wo, c)  — top row, even columns
    b = xe_ref[:, 1]        #              — bottom row, even columns
    c = xo_ref[:, 0]        #              — top row, odd columns
    d = xo_ref[:, 1]        #              — bottom row, odd columns
    o_ref[...] = jnp.maximum(jnp.maximum(a, b), jnp.maximum(c, d))


def maxpool2x2_ceil(x):
    """x: (N, H, W, C) -> (N, ceil(H/2), ceil(W/2), C)."""
    n, h, w, c = x.shape
    hp, wp = _round_up(h, 2), _round_up(w, 2)
    if (hp, wp) != (h, w):
        # ceil_mode: partial windows ignore missing elements == pad with -inf
        x = jnp.pad(x, ((0, 0), (0, hp - h), (0, wp - w), (0, 0)),
                    constant_values=-jnp.inf)
    ho, wo = hp // 2, wp // 2
    rows = n * ho
    # Even/odd column split (layout-preserving reshapes after a cheap slice).
    xe = x[:, :, 0::2, :].reshape(rows, 2, wo, c)
    xo = x[:, :, 1::2, :].reshape(rows, 2, wo, c)

    bytes_per_row = 5 * wo * c * x.dtype.itemsize
    bm = _largest_divisor_leq(rows, max(1, (4 * 1024 * 1024) // bytes_per_row))
    out = pl.pallas_call(
        _maxpool_kernel,
        out_shape=jax.ShapeDtypeStruct((rows, wo, c), x.dtype),
        grid_spec=pltpu.PrefetchScalarGridSpec(
            num_scalar_prefetch=0,
            grid=(rows // bm,),
            in_specs=[pl.BlockSpec((bm, 2, wo, c), lambda i: (i, 0, 0, 0)),
                      pl.BlockSpec((bm, 2, wo, c), lambda i: (i, 0, 0, 0))],
            out_specs=pl.BlockSpec((bm, wo, c), lambda i: (i, 0, 0)),
        ),
        compiler_params=pltpu.CompilerParams(
            dimension_semantics=("parallel",),
            vmem_limit_bytes=_VMEM_LIMIT),
    )(xe, xo)
    return out.reshape(n, ho, wo, c)


# ---------------------------------------------------------------------------
# VGG19 feature-slice forward (matches torchvision vgg19().features layering)
# ---------------------------------------------------------------------------
_VGG19_CONV_CFG = [
    (3, 64),                                            # slice1
    (64, 64), (64, 128),                                # slice2 (pool between)
    (128, 128), (128, 256),                             # slice3 (pool between)
    (256, 256), (256, 256), (256, 256), (256, 512),     # slice4 (pool before last)
    (512, 512), (512, 512), (512, 512), (512, 512),     # slice5 (pool before last)
]


def _pack_conv(w_oihw, b):
    """(Cout,Cin,3,3) f32, (Cout,) f32 -> ((9,Cin,Cout) bf16, (1,Cout) f32)."""
    cout, cin = w_oihw.shape[0], w_oihw.shape[1]
    w9 = jnp.transpose(w_oihw, (2, 3, 1, 0)).reshape(9, cin, cout)
    return w9.astype(jnp.bfloat16), b.reshape(1, cout).astype(jnp.float32)


def init_vgg19_params(key):
    # TODO(synk): pretrained VGG19 weights (torch.load(vgg_path)) have no
    # in-script equivalent; deterministic Kaiming-style synthetic weights.
    params = []
    for i, (cin, cout) in enumerate(_VGG19_CONV_CFG):
        kw, kb = jax.random.split(jax.random.fold_in(key, i))
        scale = (2.0 / (cin * 9)) ** 0.5
        w = jax.random.normal(kw, (cout, cin, 3, 3), jnp.float32) * scale
        b = jax.random.normal(kb, (cout,), jnp.float32) * 0.01
        params.append(_pack_conv(w, b))
    return params


def vgg19_forward(x_nchw, params):
    """Returns [h_relu1, ..., h_relu5], each NCHW float32 (PyTorch convention)."""
    x = jnp.transpose(x_nchw, (0, 2, 3, 1)).astype(jnp.bfloat16)   # NCHW -> NHWC bf16
    p = iter(params)
    # slice1: conv-relu
    h1 = conv3x3_relu(x, *next(p))
    # slice2: conv-relu, maxpool, conv-relu
    h = conv3x3_relu(h1, *next(p))
    h = maxpool2x2_ceil(h)
    h2 = conv3x3_relu(h, *next(p))
    # slice3: conv-relu, maxpool, conv-relu
    h = conv3x3_relu(h2, *next(p))
    h = maxpool2x2_ceil(h)
    h3 = conv3x3_relu(h, *next(p))
    # slice4: 3x(conv-relu), maxpool, conv-relu
    h = conv3x3_relu(h3, *next(p))
    h = conv3x3_relu(h, *next(p))
    h = conv3x3_relu(h, *next(p))
    h = maxpool2x2_ceil(h)
    h4 = conv3x3_relu(h, *next(p))
    # slice5: 3x(conv-relu), maxpool, conv-relu
    h = conv3x3_relu(h4, *next(p))
    h = conv3x3_relu(h, *next(p))
    h = conv3x3_relu(h, *next(p))
    h = maxpool2x2_ceil(h)
    h5 = conv3x3_relu(h, *next(p))

    to_nchw = lambda t: jnp.transpose(t, (0, 3, 1, 2)).astype(jnp.float32)
    return [to_nchw(t) for t in (h1, h2, h3, h4, h5)]


if __name__ == "__main__":
    key = jax.random.PRNGKey(0)
    k_x, k_p, k_c1, k_c2, k_c3, k_pl = jax.random.split(key, 6)

    # -- spot-check: fused conv kernel vs XLA reference
    #    (odd W, row-tiled M (nrb=3), 2 cout tiles)
    xc = jax.random.normal(k_c1, (2, 12, 11, 64), jnp.float32).astype(jnp.bfloat16)
    wc = jax.random.normal(k_c2, (512, 64, 3, 3), jnp.float32) * 0.05
    bc = jax.random.normal(k_c3, (512,), jnp.float32) * 0.1
    w9c, b2c = _pack_conv(wc, bc)
    got = jax.jit(functools.partial(conv3x3_relu, max_block_rows=4))(xc, w9c, b2c)
    ref = lax.conv_general_dilated(
        xc.astype(jnp.float32),
        w9c.reshape(3, 3, 64, 512).astype(jnp.float32),
        window_strides=(1, 1), padding="SAME",
        dimension_numbers=("NHWC", "HWIO", "NHWC")) + bc[None, None, None, :]
    ref = jnp.maximum(ref, 0.0).astype(jnp.bfloat16).astype(jnp.float32)
    got = got.astype(jnp.float32)
    assert bool(jnp.allclose(got, ref, rtol=5e-2, atol=5e-2)), \
        float(jnp.max(jnp.abs(got - ref)))

    # -- spot-check: max-pool kernel vs reference (odd H/W -> ceil_mode path)
    xpool = jax.random.normal(k_pl, (2, 7, 9, 40), jnp.float32).astype(jnp.bfloat16)
    gotp = jax.jit(maxpool2x2_ceil)(xpool)
    padp = jnp.pad(xpool, ((0, 0), (0, 1), (0, 1), (0, 0)),
                   constant_values=-jnp.inf)
    refp = padp.reshape(2, 4, 2, 5, 2, 40).max(axis=(2, 4))
    assert bool(jnp.all(gotp == refp))

    # -- full VGG19 feature-slice forward
    params = init_vgg19_params(k_p)
    x = jax.random.normal(k_x, (2, 3, 16, 16), jnp.float32)   # NCHW, small spatial
    fwd = jax.jit(vgg19_forward)
    outs = jax.block_until_ready(fwd(x, params))

    expected = [(2, 64, 16, 16), (2, 128, 8, 8), (2, 256, 4, 4),
                (2, 512, 2, 2), (2, 512, 1, 1)]
    assert [tuple(o.shape) for o in outs] == expected, \
        [tuple(o.shape) for o in outs]
    assert all(bool(jnp.all(jnp.isfinite(o))) for o in outs)
    print("KERNEL_OK")
</pallas_src>

<mosaic_0001>
module attributes {stable_mosaic.version = 11 : i64} {
  func.func @_conv3x3_kernel(%arg0: i32, %arg1: i32, %arg2: memref<1x80x64xbf16, #tpu.memory_space<vmem>>, %arg3: memref<9x64x256xbf16, #tpu.memory_space<vmem>>, %arg4: memref<1x256xf32, #tpu.memory_space<vmem>>, %arg5: memref<1x52x256xbf16, #tpu.memory_space<vmem>>) attributes {dimension_semantics = [#tpu.dimension_semantics<parallel>, #tpu.dimension_semantics<parallel>], iteration_bounds = array<i64: 6, 2>, scalar_prefetch = 0 : i64, scratch_operands = 0 : i64, tpu.core_type = #tpu.core_type<tc>, window_params = [{transform_indices = @transform_0, window_bounds = array<i64: 1, 80, 64>}, {transform_indices = @transform_1, window_bounds = array<i64: 9, 64, 256>}, {transform_indices = @transform_2, window_bounds = array<i64: 1, 256>}, {transform_indices = @transform_3, window_bounds = array<i64: 1, 52, 256>}]} {
    %cst = arith.constant 0.000000e+00 : f32
    %0 = vector.broadcast %cst : f32 to vector<52x256xf32>
    %c0 = arith.constant 0 : index
    %c0_0 = arith.constant 0 : index
    %c0_1 = arith.constant 0 : index
    %1 = vector.load %arg2[%c0, %c0_0, %c0_1] : memref<1x80x64xbf16, #tpu.memory_space<vmem>>, vector<1x52x64xbf16>
    %2 = vector.shape_cast %1 : vector<1x52x64xbf16> to vector<52x64xbf16>
    %c0_2 = arith.constant 0 : index
    %c0_3 = arith.constant 0 : index
    %c0_4 = arith.constant 0 : index
    %3 = vector.load %arg3[%c0_2, %c0_3, %c0_4] : memref<9x64x256xbf16, #tpu.memory_space<vmem>>, vector<1x64x256xbf16>
    %4 = vector.shape_cast %3 : vector<1x64x256xbf16> to vector<64x256xbf16>
    %cst_5 = arith.constant dense<0.000000e+00> : vector<52x256xf32>
    %5 = tpu.matmul %2, %4, %cst_5 {dimension_numbers = #tpu.dot_dimension_numbers<[1], [0], [0], [1], [0, 0, 1, 1], [], []>} : vector<52x64xbf16>, vector<64x256xbf16>, vector<52x256xf32> -> vector<52x256xf32>
    %6 = arith.addf %0, %5 : vector<52x256xf32>
    %c0_6 = arith.constant 0 : index
    %c1 = arith.constant 1 : index
    %c0_7 = arith.constant 0 : index
    %7 = vector.load %arg2[%c0_6, %c1, %c0_7] : memref<1x80x64xbf16, #tpu.memory_space<vmem>>, vector<1x52x64xbf16>
    %8 = vector.shape_cast %7 : vector<1x52x64xbf16> to vector<52x64xbf16>
    %c1_8 = arith.constant 1 : index
    %c0_9 = arith.constant 0 : index
    %c0_10 = arith.constant 0 : index
    %9 = vector.load %arg3[%c1_8, %c0_9, %c0_10] : memref<9x64x256xbf16, #tpu.memory_space<vmem>>, vector<1x64x256xbf16>
    %10 = vector.shape_cast %9 : vector<1x64x256xbf16> to vector<64x256xbf16>
    %cst_11 = arith.constant dense<0.000000e+00> : vector<52x256xf32>
    %11 = tpu.matmul %8, %10, %cst_11 {dimension_numbers = #tpu.dot_dimension_numbers<[1], [0], [0], [1], [0, 0, 1, 1], [], []>} : vector<52x64xbf16>, vector<64x256xbf16>, vector<52x256xf32> -> vector<52x256xf32>
    %12 = arith.addf %6, %11 : vector<52x256xf32>
    %c0_12 = arith.constant 0 : index
    %c2 = arith.constant 2 : index
    %c0_13 = arith.constant 0 : index
    %13 = vector.load %arg2[%c0_12, %c2, %c0_13] : memref<1x80x64xbf16, #tpu.memory_space<vmem>>, vector<1x52x64xbf16>
    %14 = vector.shape_cast %13 : vector<1x52x64xbf16> to vector<52x64xbf16>
    %c2_14 = arith.constant 2 : index
    %c0_15 = arith.constant 0 : index
    %c0_16 = arith.constant 0 : index
    %15 = vector.load %arg3[%c2_14, %c0_15, %c0_16] : memref<9x64x256xbf16, #tpu.memory_space<vmem>>, vector<1x64x256xbf16>
    %16 = vector.shape_cast %15 : vector<1x64x256xbf16> to vector<64x256xbf16>
    %cst_17 = arith.constant dense<0.000000e+00> : vector<52x256xf32>
    %17 = tpu.matmul %14, %16, %cst_17 {dimension_numbers = #tpu.dot_dimension_numbers<[1], [0], [0], [1], [0, 0, 1, 1], [], []>} : vector<52x64xbf16>, vector<64x256xbf16>, vector<52x256xf32> -> vector<52x256xf32>
    %18 = arith.addf %12, %17 : vector<52x256xf32>
    %c0_18 = arith.constant 0 : index
    %c13 = arith.constant 13 : index
    %c0_19 = arith.constant 0 : index
    %19 = vector.load %arg2[%c0_18, %c13, %c0_19] : memref<1x80x64xbf16, #tpu.memory_space<vmem>>, vector<1x52x64xbf16>
    %20 = vector.shape_cast %19 : vector<1x52x64xbf16> to vector<52x64xbf16>
    %c3 = arith.constant 3 : index
    %c0_20 = arith.constant 0 : index
    %c0_21 = arith.constant 0 : index
    %21 = vector.load %arg3[%c3, %c0_20, %c0_21] : memref<9x64x256xbf16, #tpu.memory_space<vmem>>, vector<1x64x256xbf16>
    %22 = vector.shape_cast %21 : vector<1x64x256xbf16> to vector<64x256xbf16>
    %cst_22 = arith.constant dense<0.000000e+00> : vector<52x256xf32>
    %23 = tpu.matmul %20, %22, %cst_22 {dimension_numbers = #tpu.dot_dimension_numbers<[1], [0], [0], [1], [0, 0, 1, 1], [], []>} : vector<52x64xbf16>, vector<64x256xbf16>, vector<52x256xf32> -> vector<52x256xf32>
    %24 = arith.addf %18, %23 : vector<52x256xf32>
    %c0_23 = arith.constant 0 : index
    %c14 = arith.constant 14 : index
    %c0_24 = arith.constant 0 : index
    %25 = vector.load %arg2[%c0_23, %c14, %c0_24] : memref<1x80x64xbf16, #tpu.memory_space<vmem>>, vector<1x52x64xbf16>
    %26 = vector.shape_cast %25 : vector<1x52x64xbf16> to vector<52x64xbf16>
    %c4 = arith.constant 4 : index
    %c0_25 = arith.constant 0 : index
    %c0_26 = arith.constant 0 : index
    %27 = vector.load %arg3[%c4, %c0_25, %c0_26] : memref<9x64x256xbf16, #tpu.memory_space<vmem>>, vector<1x64x256xbf16>
    %28 = vector.shape_cast %27 : vector<1x64x256xbf16> to vector<64x256xbf16>
    %cst_27 = arith.constant dense<0.000000e+00> : vector<52x256xf32>
    %29 = tpu.matmul %26, %28, %cst_27 {dimension_numbers = #tpu.dot_dimension_numbers<[1], [0], [0], [1], [0, 0, 1, 1], [], []>} : vector<52x64xbf16>, vector<64x256xbf16>, vector<52x256xf32> -> vector<52x256xf32>
    %30 = arith.addf %24, %29 : vector<52x256xf32>
    %c0_28 = arith.constant 0 : index
    %c15 = arith.constant 15 : index
    %c0_29 = arith.constant 0 : index
    %31 = vector.load %arg2[%c0_28, %c15, %c0_29] : memref<1x80x64xbf16, #tpu.memory_space<vmem>>, vector<1x52x64xbf16>
    %32 = vector.shape_cast %31 : vector<1x52x64xbf16> to vector<52x64xbf16>
    %c5 = arith.constant 5 : index
    %c0_30 = arith.constant 0 : index
    %c0_31 = arith.constant 0 : index
    %33 = vector.load %arg3[%c5, %c0_30, %c0_31] : memref<9x64x256xbf16, #tpu.memory_space<vmem>>, vector<1x64x256xbf16>
    %34 = vector.shape_cast %33 : vector<1x64x256xbf16> to vector<64x256xbf16>
    %cst_32 = arith.constant dense<0.000000e+00> : vector<52x256xf32>
    %35 = tpu.matmul %32, %34, %cst_32 {dimension_numbers = #tpu.dot_dimension_numbers<[1], [0], [0], [1], [0, 0, 1, 1], [], []>} : vector<52x64xbf16>, vector<64x256xbf16>, vector<52x256xf32> -> vector<52x256xf32>
    %36 = arith.addf %30, %35 : vector<52x256xf32>
    %c0_33 = arith.constant 0 : index
    %c26 = arith.constant 26 : index
    %c0_34 = arith.constant 0 : index
    %37 = vector.load %arg2[%c0_33, %c26, %c0_34] : memref<1x80x64xbf16, #tpu.memory_space<vmem>>, vector<1x52x64xbf16>
    %38 = vector.shape_cast %37 : vector<1x52x64xbf16> to vector<52x64xbf16>
    %c6 = arith.constant 6 : index
    %c0_35 = arith.constant 0 : index
    %c0_36 = arith.constant 0 : index
    %39 = vector.load %arg3[%c6, %c0_35, %c0_36] : memref<9x64x256xbf16, #tpu.memory_space<vmem>>, vector<1x64x256xbf16>
    %40 = vector.shape_cast %39 : vector<1x64x256xbf16> to vector<64x256xbf16>
    %cst_37 = arith.constant dense<0.000000e+00> : vector<52x256xf32>
    %41 = tpu.matmul %38, %40, %cst_37 {dimension_numbers = #tpu.dot_dimension_numbers<[1], [0], [0], [1], [0, 0, 1, 1], [], []>} : vector<52x64xbf16>, vector<64x256xbf16>, vector<52x256xf32> -> vector<52x256xf32>
    %42 = arith.addf %36, %41 : vector<52x256xf32>
    %c0_38 = arith.constant 0 : index
    %c27 = arith.constant 27 : index
    %c0_39 = arith.constant 0 : index
    %43 = vector.load %arg2[%c0_38, %c27, %c0_39] : memref<1x80x64xbf16, #tpu.memory_space<vmem>>, vector<1x52x64xbf16>
    %44 = vector.shape_cast %43 : vector<1x52x64xbf16> to vector<52x64xbf16>
    %c7 = arith.constant 7 : index
    %c0_40 = arith.constant 0 : index
    %c0_41 = arith.constant 0 : index
    %45 = vector.load %arg3[%c7, %c0_40, %c0_41] : memref<9x64x256xbf16, #tpu.memory_space<vmem>>, vector<1x64x256xbf16>
    %46 = vector.shape_cast %45 : vector<1x64x256xbf16> to vector<64x256xbf16>
    %cst_42 = arith.constant dense<0.000000e+00> : vector<52x256xf32>
    %47 = tpu.matmul %44, %46, %cst_42 {dimension_numbers = #tpu.dot_dimension_numbers<[1], [0], [0], [1], [0, 0, 1, 1], [], []>} : vector<52x64xbf16>, vector<64x256xbf16>, vector<52x256xf32> -> vector<52x256xf32>
    %48 = arith.addf %42, %47 : vector<52x256xf32>
    %c0_43 = arith.constant 0 : index
    %c28 = arith.constant 28 : index
    %c0_44 = arith.constant 0 : index
    %49 = vector.load %arg2[%c0_43, %c28, %c0_44] : memref<1x80x64xbf16, #tpu.memory_space<vmem>>, vector<1x52x64xbf16>
    %50 = vector.shape_cast %49 : vector<1x52x64xbf16> to vector<52x64xbf16>
    %c8 = arith.constant 8 : index
    %c0_45 = arith.constant 0 : index
    %c0_46 = arith.constant 0 : index
    %51 = vector.load %arg3[%c8, %c0_45, %c0_46] : memref<9x64x256xbf16, #tpu.memory_space<vmem>>, vector<1x64x256xbf16>
    %52 = vector.shape_cast %51 : vector<1x64x256xbf16> to vector<64x256xbf16>
    %cst_47 = arith.constant dense<0.000000e+00> : vector<52x256xf32>
    %53 = tpu.matmul %50, %52, %cst_47 {dimension_numbers = #tpu.dot_dimension_numbers<[1], [0], [0], [1], [0, 0, 1, 1], [], []>} : vector<52x64xbf16>, vector<64x256xbf16>, vector<52x256xf32> -> vector<52x256xf32>
    %54 = arith.addf %48, %53 : vector<52x256xf32>
    %c0_48 = arith.constant 0 : index
    %c0_49 = arith.constant 0 : index
    %55 = vector.load %arg4[%c0_48, %c0_49] : memref<1x256xf32, #tpu.memory_space<vmem>>, vector<1x256xf32>
    %56 = vector.broadcast %55 : vector<1x256xf32> to vector<52x256xf32>
    %57 = arith.addf %54, %56 : vector<52x256xf32>
    %cst_50 = arith.constant 0.000000e+00 : f32
    %58 = vector.broadcast %cst_50 : f32 to vector<52x256xf32>
    %59 = arith.maximumf %57, %58 : vector<52x256xf32>
    %60 = arith.truncf %59 : vector<52x256xf32> to vector<52x256xbf16>
    %c0_51 = arith.constant 0 : index
    %c0_52 = arith.constant 0 : index
    %c0_53 = arith.constant 0 : index
    %61 = vector.load %arg5[%c0_51, %c0_52, %c0_53] : memref<1x52x256xbf16, #tpu.memory_space<vmem>>, vector<1x52x256xbf16>
    %62 = vector.shape_cast %61 : vector<1x52x256xbf16> to vector<52x256xbf16>
    %63 = vector.shape_cast %60 : vector<52x256xbf16> to vector<1x52x256xbf16>
    tpu.vector_store %arg5[%c0_51, %c0_52, %c0_53], %63 {strides = array<i32>} : memref<1x52x256xbf16, #tpu.memory_space<vmem>>, vector<1x52x256xbf16>,
    return
  }
  func.func @transform_0(%arg0: i32, %arg1: i32) -> (i32, i32, i32) {
    %c0_i32 = arith.constant 0 : i32
    %c0_i32_0 = arith.constant 0 : i32
    %c0_i32_1 = arith.constant 0 : i32
    return %arg0, %c0_i32, %c0_i32_0 : i32, i32, i32
  }
  func.func @transform_1(%arg0: i32, %arg1: i32) -> (i32, i32, i32) {
    %c0_i32 = arith.constant 0 : i32
    %c0_i32_0 = arith.constant 0 : i32
    %c0_i32_1 = arith.constant 0 : i32
    return %c0_i32, %c0_i32_0, %arg1 : i32, i32, i32
  }
  func.func @transform_2(%arg0: i32, %arg1: i32) -> (i32, i32) {
    %c0_i32 = arith.constant 0 : i32
    %c0_i32_0 = arith.constant 0 : i32
    return %c0_i32, %arg1 : i32, i32
  }
  func.func @transform_3(%arg0: i32, %arg1: i32) -> (i32, i32, i32) {
    %c0_i32 = arith.constant 0 : i32
    %c0_i32_0 = arith.constant 0 : i32
    return %arg0, %c0_i32, %arg1 : i32, i32, i32
  }
}

</mosaic_0001>

<bundles_post_ra>
// kernel: conv3x3_relu.1
= control target key start
LH: loop header
LB: loop body
LE: loop exit
PB: predicated region body
PF: predicated region fallthrough
CT: control target
= control target key end

     0   :  { %s2862_s12 = smov 0   ;;  %s2864_s13 = smov 0   ;;  %s3652_s0 = inlined_call_operand.vmem [shape: bf16[6,80,64], index: 0, kind: input, shape index: {}]   ;;  %s3653_s1 = inlined_call_operand.vmem [shape: bf16[9,64,512], index: 1, kind: input, shape index: {}]   ;;  %s3654_s2 = inlined_call_operand.vmem [shape: f32[1,512], index: 2, kind: input, shape index: {}]   ;;  %s3655_s3 = inlined_call_operand.vmem [shape: bf16[6,52,512], index: 3, kind: output, shape index: {}]  }
   0x1   :  { %s2866_s14 = smov 0   ;;  %s2868_s15 = smov 0  }
   0x2   :  { %s2870_s16 = smov 0   ;;  %s2872_s17 = smov 0  }
   0x3   :  { %s2874_s18 = smov 0   ;;  %s2876_s19 = smov 0  }
   0x4   :  { %s2878_s20 = smov 0  }
   0x5 LB: > { %s2339_s21 = sadd.s32 4294967295, %s2839_s20   ;;  %s22_s22 = sadd.s32 1, %s2831_s18  ;;  %s2839_s20 = sphi %s2878_s20, %s13_s20   ;;  %s2835_s19 = sphi %s2876_s19, %s3698_s19   ;;  %s2831_s18 = sphi %s2874_s18, %s3697_s18   ;;  %s2827_s17 = sphi %s2872_s17, %s3696_s17   ;;  %s2823_s16 = sphi %s2870_s16, %s3695_s16   ;;  %s2819_s15 = sphi %s2868_s15, %s3694_s15   ;;  %s2815_s14 = sphi %s2866_s14, %s3693_s14   ;;  %s2811_s13 = sphi %s2864_s13, %s3692_s13   ;;  %s2807_s12 = sphi %s2862_s12, %s3691_s12  }
   0x6   : > { %p23_p0 = scmp.ge.s32.totalorder %s22_s22, 2  ;;  %s25_s23 = sadd.s32 1, %s2835_s19 }
   0x7   : > { %s58_s24 = sadd.s32 1, %s2819_s15  ;;  %p65_p1 = scmp.ne.s32.totalorder %s2819_s15, %s2815_s14 }
   0x8   : > { %s3700_s22 = smov (%p23_p0, %s22_s22), 0  ;;  %s3702_s23 = smov (!%p23_p0, %s25_s23), %s2835_s19 }
   0x9   : > { %s55_s25 = ssub.s32 %s2831_s18, %s3700_s22  ;;  %p66_p2 = scmp.eq.s32.totalorder %s2839_s20, 0 }
   0xa   : > { %p27_p3 = scmp.ge.s32.totalorder %s3702_s23, 6  ;;  %p56_p4 = scmp.eq.s32.totalorder %s55_s25, 0 }
   0xb   : > { %p67_p5 = por %p66_p2, %p65_p1  ;;  %s112_s26 = sadd.s32 1, %s2811_s13 }
   0xc   : > { %s3704_s23 = smov (%p27_p3, %s3702_s23), 0  ;;  %p122_p6 = scmp.ne.s32.totalorder %s2811_s13, %s2807_s12 }
   0xd   : > { %s2923_s27 = scalar_select %p56_p4, %s2819_s15, %s58_s24  }
   0xe   : > { %s107_s28 = ssub.s32 %s2835_s19, %s3704_s23  ;;  %p123_p7 = scmp.eq.s32.totalorder %s2339_s21, 11 }
   0xf   : > { %s109_s29 = sor.u32 %s107_s28, %s55_s25  ;;  %p2342_p10 = scmp.ge.s32.totalorder %s2839_s20, 12 }
  0x10   : > { %p110_p8 = scmp.eq.s32.totalorder %s109_s29, 0  ;;  %p2929_p9 = por %p123_p7, %p122_p6 }
  0x11   : > { %145 = sbr.rel (%p2342_p10) target bundleno = 62 (0x3e), region = 16 }
  0x12   : > { %s2934_s4 = scalar_select %p110_p8, %s2811_s13, %s112_s26  }
  0x16   : > { %156 = sbr.rel (!%p67_p5) target bundleno = 62 (0x3e), region = 24  ;;  %s158_s5 = sand.u32 (%p67_p5), 1, %s2819_s15  }
  0x17   : > { %s2549_s6 = sshll.u32 (%p67_p5), %s2831_s18, 3  ;;  %s2565_s7 = smul.u32 (%p67_p5), 576, %s158_s5 }
  0x18   : > { %s2942_s10 = scalar_lea.vmem (%p67_p5), %s3653_s1, %s2549_s6 }
  0x19   : > { %v334_v0 = vld [vmem:[%s2942_s10] sm:$0xff] (%p67_p5)  ;;  %v336_v1 = vld [vmem:[%s2942_s10 + $0x10] sm:$0xff] (%p67_p5)  ;;  %s2950_s11 = scalar_lea.vmem (%p67_p5), [#allocation2], %s2565_s7 }
  0x1a   : > { %v338_v2 = vld [vmem:[%s2942_s10 + $0x20] sm:$0xff] (%p67_p5)  ;;  %v340_v3 = vld [vmem:[%s2942_s10 + $0x30] sm:$0xff] (%p67_p5)  ;;  %335 = vst [vmem:[%s2950_s11] sm:$0xff] (%p67_p5), %v334_v0  ;;  %337 = vst [vmem:[%s2950_s11 + $0x8] sm:$0xff] (%p67_p5), %v336_v1 }
  0x1b   : > { %v342_v4 = vld [vmem:[%s2942_s10 + $0x40] sm:$0xff]  ;;  %v344_v5 = vld [vmem:[%s2942_s10 + $0x50] sm:$0xff]  ;;  %339 = vst [vmem:[%s2950_s11 + $0x10] sm:$0xff] %v338_v2  ;;  %341 = vst [vmem:[%s2950_s11 + $0x18] sm:$0xff] %v340_v3 }
  0x1c   : > { %343 = vst [vmem:[%s2950_s11 + $0x20] sm:$0xff] %v342_v4  ;;  %345 = vst [vmem:[%s2950_s11 + $0x28] sm:$0xff] %v344_v5  ;;  %v346_v6 = vld [vmem:[%s2942_s10 + $0x60] sm:$0xff]  ;;  %v348_v7 = vld [vmem:[%s2942_s10 + $0x70] sm:$0xff] }
  0x1d   : > { %v350_v8 = vld [vmem:[%s2942_s10 + $0x80] sm:$0xff]  ;;  %347 = vst [vmem:[%s2950_s11 + $0x30] sm:$0xff] %v346_v6  ;;  %349 = vst [vmem:[%s2950_s11 + $0x38] sm:$0xff] %v348_v7  ;;  %v352_v9 = vld [vmem:[%s2942_s10 + $0x90] sm:$0xff] }
  0x1e   : > { %351 = vst [vmem:[%s2950_s11 + $0x40] sm:$0xff] %v350_v8  ;;  %v354_v10 = vld [vmem:[%s2942_s10 + $0xa0] sm:$0xff]  ;;  %v356_v11 = vld [vmem:[%s2942_s10 + $0xb0] sm:$0xff]  ;;  %353 = vst [vmem:[%s2950_s11 + $0x48] sm:$0xff] %v352_v9 }
  0x1f   : > { %355 = vst [vmem:[%s2950_s11 + $0x50] sm:$0xff] %v354_v10  ;;  %357 = vst [vmem:[%s2950_s11 + $0x58] sm:$0xff] %v356_v11  ;;  %v358_v12 = vld [vmem:[%s2942_s10 + $0xc0] sm:$0xff]  ;;  %v360_v13 = vld [vmem:[%s2942_s10 + $0xd0] sm:$0xff] }
  0x20   : > { %v362_v14 = vld [vmem:[%s2942_s10 + $0xe0] sm:$0xff]  ;;  %359 = vst [vmem:[%s2950_s11 + $0x60] sm:$0xff] %v358_v12  ;;  %361 = vst [vmem:[%s2950_s11 + $0x68] sm:$0xff] %v360_v13  ;;  %v364_v15 = vld [vmem:[%s2942_s10 + $0xf0] sm:$0xff] }
  0x21   : > { %363 = vst [vmem:[%s2950_s11 + $0x70] sm:$0xff] %v362_v14  ;;  %v366_v16 = vld [vmem:[%s2942_s10 + $0x100] sm:$0xff]  ;;  %v368_v17 = vld [vmem:[%s2942_s10 + $0x110] sm:$0xff]  ;;  %365 = vst [vmem:[%s2950_s11 + $0x78] sm:$0xff] %v364_v15 }
  0x22   : > { %367 = vst [vmem:[%s2950_s11 + $0x80] sm:$0xff] %v366_v16  ;;  %369 = vst [vmem:[%s2950_s11 + $0x88] sm:$0xff] %v368_v17  ;;  %v370_v18 = vld [vmem:[%s2942_s10 + $0x120] sm:$0xff]  ;;  %v372_v19 = vld [vmem:[%s2942_s10 + $0x130] sm:$0xff] }
  0x23   : > { %v374_v20 = vld [vmem:[%s2942_s10 + $0x140] sm:$0xff]  ;;  %371 = vst [vmem:[%s2950_s11 + $0x90] sm:$0xff] %v370_v18  ;;  %373 = vst [vmem:[%s2950_s11 + $0x98] sm:$0xff] %v372_v19  ;;  %v376_v21 = vld [vmem:[%s2942_s10 + $0x150] sm:$0xff] }
  0x24   : > { %375 = vst [vmem:[%s2950_s11 + $0xa0] sm:$0xff] %v374_v20  ;;  %v378_v22 = vld [vmem:[%s2942_s10 + $0x160] sm:$0xff]  ;;  %v380_v23 = vld [vmem:[%s2942_s10 + $0x170] sm:$0xff]  ;;  %377 = vst [vmem:[%s2950_s11 + $0xa8] sm:$0xff] %v376_v21 }
  0x25   : > { %379 = vst [vmem:[%s2950_s11 + $0xb0] sm:$0xff] %v378_v22  ;;  %381 = vst [vmem:[%s2950_s11 + $0xb8] sm:$0xff] %v380_v23  ;;  %v382_v24 = vld [vmem:[%s2942_s10 + $0x180] sm:$0xff]  ;;  %v384_v25 = vld [vmem:[%s2942_s10 + $0x190] sm:$0xff] }
  0x26   : > { %v386_v26 = vld [vmem:[%s2942_s10 + $0x1a0] sm:$0xff]  ;;  %383 = vst [vmem:[%s2950_s11 + $0xc0] sm:$0xff] %v382_v24  ;;  %385 = vst [vmem:[%s2950_s11 + $0xc8] sm:$0xff] %v384_v25  ;;  %v388_v27 = vld [vmem:[%s2942_s10 + $0x1b0] sm:$0xff] }
  0x27   : > { %387 = vst [vmem:[%s2950_s11 + $0xd0] sm:$0xff] %v386_v26  ;;  %v390_v28 = vld [vmem:[%s2942_s10 + $0x1c0] sm:$0xff]  ;;  %v392_v29 = vld [vmem:[%s2942_s10 + $0x1d0] sm:$0xff]  ;;  %389 = vst [vmem:[%s2950_s11 + $0xd8] sm:$0xff] %v388_v27 }
  0x28   : > { %391 = vst [vmem:[%s2950_s11 + $0xe0] sm:$0xff] %v390_v28  ;;  %393 = vst [vmem:[%s2950_s11 + $0xe8] sm:$0xff] %v392_v29  ;;  %v394_v30 = vld [vmem:[%s2942_s10 + $0x1e0] sm:$0xff]  ;;  %v396_v31 = vld [vmem:[%s2942_s10 + $0x1f0] sm:$0xff] }
  0x29   : > { %v398_v32 = vld [vmem:[%s2942_s10 + $0x200] sm:$0xff]  ;;  %395 = vst [vmem:[%s2950_s11 + $0xf0] sm:$0xff] %v394_v30  ;;  %397 = vst [vmem:[%s2950_s11 + $0xf8] sm:$0xff] %v396_v31  ;;  %v400_v33 = vld [vmem:[%s2942_s10 + $0x210] sm:$0xff] }
  0x2a   : > { %399 = vst [vmem:[%s2950_s11 + $0x100] sm:$0xff] %v398_v32  ;;  %v402_v34 = vld [vmem:[%s2942_s10 + $0x220] sm:$0xff]  ;;  %v404_v35 = vld [vmem:[%s2942_s10 + $0x230] sm:$0xff]  ;;  %401 = vst [vmem:[%s2950_s11 + $0x108] sm:$0xff] %v400_v33 }
  0x2b   : > { %403 = vst [vmem:[%s2950_s11 + $0x110] sm:$0xff] %v402_v34  ;;  %405 = vst [vmem:[%s2950_s11 + $0x118] sm:$0xff] %v404_v35  ;;  %v406_v36 = vld [vmem:[%s2942_s10 + $0x240] sm:$0xff]  ;;  %v408_v37 = vld [vmem:[%s2942_s10 + $0x250] sm:$0xff] }
  0x2c   : > { %v410_v38 = vld [vmem:[%s2942_s10 + $0x260] sm:$0xff]  ;;  %407 = vst [vmem:[%s2950_s11 + $0x120] sm:$0xff] %v406_v36  ;;  %409 = vst [vmem:[%s2950_s11 + $0x128] sm:$0xff] %v408_v37  ;;  %v412_v39 = vld [vmem:[%s2942_s10 + $0x270] sm:$0xff] }
  0x2d   : > { %411 = vst [vmem:[%s2950_s11 + $0x130] sm:$0xff] %v410_v38  ;;  %v414_v40 = vld [vmem:[%s2942_s10 + $0x280] sm:$0xff]  ;;  %v416_v41 = vld [vmem:[%s2942_s10 + $0x290] sm:$0xff]  ;;  %413 = vst [vmem:[%s2950_s11 + $0x138] sm:$0xff] %v412_v39 }
  0x2e   : > { %415 = vst [vmem:[%s2950_s11 + $0x140] sm:$0xff] %v414_v40  ;;  %417 = vst [vmem:[%s2950_s11 + $0x148] sm:$0xff] %v416_v41  ;;  %v418_v42 = vld [vmem:[%s2942_s10 + $0x2a0] sm:$0xff]  ;;  %v420_v43 = vld [vmem:[%s2942_s10 + $0x2b0] sm:$0xff] }
  0x2f   : > { %v422_v44 = vld [vmem:[%s2942_s10 + $0x2c0] sm:$0xff]  ;;  %419 = vst [vmem:[%s2950_s11 + $0x150] sm:$0xff] %v418_v42  ;;  %421 = vst [vmem:[%s2950_s11 + $0x158] sm:$0xff] %v420_v43  ;;  %v424_v45 = vld [vmem:[%s2942_s10 + $0x2d0] sm:$0xff] }
  0x30   : > { %423 = vst [vmem:[%s2950_s11 + $0x160] sm:$0xff] %v422_v44  ;;  %v426_v46 = vld [vmem:[%s2942_s10 + $0x2e0] sm:$0xff]  ;;  %v428_v47 = vld [vmem:[%s2942_s10 + $0x2f0] sm:$0xff]  ;;  %425 = vst [vmem:[%s2950_s11 + $0x168] sm:$0xff] %v424_v45 }
  0x31   : > { %427 = vst [vmem:[%s2950_s11 + $0x170] sm:$0xff] %v426_v46  ;;  %429 = vst [vmem:[%s2950_s11 + $0x178] sm:$0xff] %v428_v47  ;;  %v430_v48 = vld [vmem:[%s2942_s10 + $0x300] sm:$0xff]  ;;  %v432_v49 = vld [vmem:[%s2942_s10 + $0x310] sm:$0xff] }
  0x32   : > { %v434_v50 = vld [vmem:[%s2942_s10 + $0x320] sm:$0xff]  ;;  %431 = vst [vmem:[%s2950_s11 + $0x180] sm:$0xff] %v430_v48  ;;  %433 = vst [vmem:[%s2950_s11 + $0x188] sm:$0xff] %v432_v49  ;;  %v436_v51 = vld [vmem:[%s2942_s10 + $0x330] sm:$0xff] }
  0x33   : > { %435 = vst [vmem:[%s2950_s11 + $0x190] sm:$0xff] %v434_v50  ;;  %v438_v52 = vld [vmem:[%s2942_s10 + $0x340] sm:$0xff]  ;;  %v440_v53 = vld [vmem:[%s2942_s10 + $0x350] sm:$0xff]  ;;  %437 = vst [vmem:[%s2950_s11 + $0x198] sm:$0xff] %v436_v51 }
  0x34   : > { %439 = vst [vmem:[%s2950_s11 + $0x1a0] sm:$0xff] %v438_v52  ;;  %441 = vst [vmem:[%s2950_s11 + $0x1a8] sm:$0xff] %v440_v53  ;;  %v442_v54 = vld [vmem:[%s2942_s10 + $0x360] sm:$0xff]  ;;  %v444_v55 = vld [vmem:[%s2942_s10 + $0x370] sm:$0xff] }
  0x35   : > { %v446_v56 = vld [vmem:[%s2942_s10 + $0x380] sm:$0xff]  ;;  %443 = vst [vmem:[%s2950_s11 + $0x1b0] sm:$0xff] %v442_v54  ;;  %445 = vst [vmem:[%s2950_s11 + $0x1b8] sm:$0xff] %v444_v55  ;;  %v448_v57 = vld [vmem:[%s2942_s10 + $0x390] sm:$0xff] }
  0x36   : > { %447 = vst [vmem:[%s2950_s11 + $0x1c0] sm:$0xff] %v446_v56  ;;  %v450_v58 = vld [vmem:[%s2942_s10 + $0x3a0] sm:$0xff]  ;;  %v452_v59 = vld [vmem:[%s2942_s10 + $0x3b0] sm:$0xff]  ;;  %449 = vst [vmem:[%s2950_s11 + $0x1c8] sm:$0xff] %v448_v57 }
  0x37   : > { %451 = vst [vmem:[%s2950_s11 + $0x1d0] sm:$0xff] %v450_v58  ;;  %453 = vst [vmem:[%s2950_s11 + $0x1d8] sm:$0xff] %v452_v59  ;;  %v454_v60 = vld [vmem:[%s2942_s10 + $0x3c0] sm:$0xff]  ;;  %v456_v61 = vld [vmem:[%s2942_s10 + $0x3d0] sm:$0xff] }
  0x38   : > { %v458_v62 = vld [vmem:[%s2942_s10 + $0x3e0] sm:$0xff]  ;;  %455 = vst [vmem:[%s2950_s11 + $0x1e0] sm:$0xff] %v454_v60  ;;  %457 = vst [vmem:[%s2950_s11 + $0x1e8] sm:$0xff] %v456_v61  ;;  %v460_v63 = vld [vmem:[%s2942_s10 + $0x3f0] sm:$0xff] }
  0x39   : > { %459 = vst [vmem:[%s2950_s11 + $0x1f0] sm:$0xff] %v458_v62  ;;  %v462_v0 = vld [vmem:[%s2942_s10 + $0x400] sm:$0xff]  ;;  %v464_v1 = vld [vmem:[%s2942_s10 + $0x410] sm:$0xff]  ;;  %461 = vst [vmem:[%s2950_s11 + $0x1f8] sm:$0xff] %v460_v63 }
  0x3a   : > { %463 = vst [vmem:[%s2950_s11 + $0x200] sm:$0xff] %v462_v0  ;;  %465 = vst [vmem:[%s2950_s11 + $0x208] sm:$0xff] %v464_v1  ;;  %v466_v2 = vld [vmem:[%s2942_s10 + $0x420] sm:$0xff]  ;;  %v468_v3 = vld [vmem:[%s2942_s10 + $0x430] sm:$0xff] }
  0x3b   : > { %v470_v4 = vld [vmem:[%s2942_s10 + $0x440] sm:$0xff]  ;;  %467 = vst [vmem:[%s2950_s11 + $0x210] sm:$0xff] %v466_v2  ;;  %469 = vst [vmem:[%s2950_s11 + $0x218] sm:$0xff] %v468_v3  ;;  %v472_v5 = vld [vmem:[%s2942_s10 + $0x450] sm:$0xff] }
  0x3c   : > { %471 = vst [vmem:[%s2950_s11 + $0x220] sm:$0xff] %v470_v4  ;;  %v474_v6 = vld [vmem:[%s2942_s10 + $0x460] sm:$0xff]  ;;  %v476_v7 = vld [vmem:[%s2942_s10 + $0x470] sm:$0xff]  ;;  %473 = vst [vmem:[%s2950_s11 + $0x228] sm:$0xff] %v472_v5 }
  0x3d   : > { %475 = vst [vmem:[%s2950_s11 + $0x230] sm:$0xff] %v474_v6  ;;  %477 = vst [vmem:[%s2950_s11 + $0x238] sm:$0xff] %v476_v7 }
  0x3e PF: > { %p2345_p11 = scmp.ge.s32.totalorder %s2839_s20, 1  ;;  %p490_p12 = scmp.lt.s32.totalorder %s2839_s20, 13 }
  0x40   : > { %p491_p13 = pnand %p2345_p11, %p490_p12 }
  0x42   : > { %494 = sbr.rel (%p491_p13) target bundleno = 442 (0x1ba), region = 66 }
  0x47   : > { %s497_s21 = sand.u32 1, %s2815_s14   ;;  %p528_p0 = scmp.lt.s32.totalorder %s2827_s17, 5  ;;  %v2841_v8 = vmov 0   ;;  %vm584_vm0 = vsmask.f32 7424  ;;  %vm656_vm1 = vcmask 523264  }
  0x48   : > { %s2566_s24 = smul.u32 576, %s497_s21  ;;  %701 = vmatprep.mubr.bf16.mxu0 %v2841_v8  ;;  %721 = vmatprep.mubr.bf16.mxu1 %v2841_v8  ;;  %vm876_vm2 = vcmask 1046528   ;;  %vm1058_vm3 = vsmask.f32 5376  ;;  %vm1244_vm4 = vcmask 1044480   ;;  %vm1942_vm7 = vcmask 1045504  }
  0x49   : > { %s529_s25 = scalar_select %p528_p0, %s2827_s17, 5  ;;  %vm1402_vm5 = vsmask.f32 4352  ;;  %vm1756_vm6 = vsmask.f32 6400 }
  0x4a   : > { %s3097_s26 = scalar_lea.vmem [#allocation2], %s2566_s24  ;;  %s3490_s6 = sshll.u32 %s2823_s16, 1 }
  0x4b   : > { %v2643_v9 = vld [vmem:[%s3097_s26 + $0x74] ss:$8 sps:$4 sm:$0xff]   ;;  %s2568_s28 = smul.u32 40, %s529_s25  ;;  %v2645_v10 = vld [vmem:[%s3097_s26 + $0x70] ss:$8 sps:$4 sm:$0xff]   ;;  %p535_p1 = scmp.lt.s32.totalorder %s3490_s6, 3 }
  0x4c   : > { %677 = vmatprep.subr.bf16.mxu0 %v2643_v9  ;;  %2557 = vmatprep.subr.bf16.mxu1 %v2643_v9  ;;  %v2646_v11 = vld [vmem:[%s3097_s26 + $0x64] ss:$8 sps:$4 sm:$0xff]   ;;  %v2648_v12 = vld [vmem:[%s3097_s26 + $0x60] ss:$8 sps:$4 sm:$0xff]   ;;  %v2649_v13 = vld [vmem:[%s3097_s26 + $0x54] ss:$8 sps:$4 sm:$0xff]  }
  0x4d   : > { %s3105_s5 = scalar_lea.vmem %s3652_s0, %s2568_s28  ;;  %678 = vmatpush1.bf16.msra.mxu0 %v2645_v10  ;;  %2561 = vmatpush1.bf16.msra.mxu1 %v2645_v10  ;;  %v2651_v14 = vld [vmem:[%s3097_s26 + $0x50] ss:$8 sps:$4 sm:$0xff]   ;;  %v2652_v17 = vld [vmem:[%s3097_s26 + $0x44] ss:$8 sps:$4 sm:$0xff]   ;;  %v2654_v25 = vld [vmem:[%s3097_s26 + $0x40] ss:$8 sps:$4 sm:$0xff]  }
  0x4e   : > { %679 = vmatprep.subr.bf16.mxu0 %v2646_v11  ;;  %2558 = vmatprep.subr.bf16.mxu1 %v2646_v11  ;;  %v541_v15 = vld [vmem:[%s3105_s5] sm:$0xf]  ;;  %v3112_v16 = vld [vmem:[%s3105_s5 + $0x4] sm:$0xf]  ;;  %v3119_v19 = vld [vmem:[%s3105_s5 + $0x8] sm:$0xff]   ;;  %s536_s16 = scalar_select %p535_p1, %s3490_s6, 3 }
  0x4f   : > { %v3116_v18 = vcombine.low %v541_v15, %v3112_v16  ;;  %v593_v22 = vshll.u32 %v3119_v19, 16  ;;  %v3125_v23 = vld [vmem:[%s3105_s5 + $0x10] sm:$0xff]   ;;  %v3128_v24 = vld [vmem:[%s3105_s5 + $0x18] ss:$0 sps:$4 sm:$0x77]   ;;  %v597_v41 = vshrl.u32 %v3119_v19, 16 }
  0x50   : > { %v601_v27 = vshll.u32 %v3125_v23, 16  ;;  %v605_v28 = vshrl.u32 %v3125_v23, 16  ;;  %v609_v30 = vshll.u32 %v3128_v24, 16  ;;  %v2661_v31 = vld [vmem:[%s3097_s26 + $0x34] ss:$8 sps:$4 sm:$0xff]   ;;  %v613_v46 = vshrl.u32 %v3128_v24, 16  ;;  %s537_s9 = scalar_lea.vmem %s3654_s2, %s536_s16 }
  0x51   : > { %680 = vmatpush1.bf16.msra.mxu0 %v2648_v12  ;;  %2562 = vmatpush1.bf16.msra.mxu1 %v2648_v12  ;;  %v586_v20 = vshrl.u32 %v3116_v18, 16  ;;  %v588_v21 = vshll.u32 %v3116_v18, 16  ;;  %v595_v29 = vrot.slane %v593_v22, 1  ;;  %v2664_v34 = vld [vmem:[%s3097_s26 + $0xb4] ss:$8 sps:$4 sm:$0xff]   ;;  %v878_v61 = vrot.slane %v3119_v19, 1 }
  0x52   : > { %681 = vmatprep.subr.bf16.mxu0 %v2649_v13  ;;  %2559 = vmatprep.subr.bf16.mxu1 %v2649_v13  ;;  %v603_v33 = vrot.slane %v601_v27, 1  ;;  %v611_v35 = vrot.slane %v609_v30, 1  ;;  %v2659_v37 = vld [vmem:[%s3097_s26 + $0x30] ss:$8 sps:$4 sm:$0xff]   ;;  %v2667_v40 = vld [vmem:[%s3097_s26 + $0x24] ss:$8 sps:$4 sm:$0xff]  }
  0x53   : > { %v590_v26 = vrot.slane %v588_v21, 1  ;;  %v2662_v39 = vld [vmem:[%s3097_s26 + $0xb0] ss:$8 sps:$4 sm:$0xff]   ;;  %v2670_v43 = vld [vmem:[%s3097_s26 + $0xa4] ss:$8 sps:$4 sm:$0xff]   ;;  %v599_v47 = vor.u32 %v597_v41, %v595_v29  ;;  %v880_v6 = vrot.slane %v3125_v23, 1 }
  0x54   : > { %v607_v36 = vor.u32 %v605_v28, %v603_v33  ;;  %v2665_v44 = vld [vmem:[%s3097_s26 + $0x20] ss:$8 sps:$4 sm:$0xff]   ;;  %v2673_v48 = vld [vmem:[%s3097_s26 + $0x14] ss:$8 sps:$4 sm:$0xff]   ;;  %v615_v51 = vor.u32 %v613_v46, %v611_v35  ;;  %v2671_v52 = vld [vmem:[%s3097_s26 + $0x10] ss:$8 sps:$4 sm:$0xff]  }
  0x55   : > { %682 = vmatpush1.bf16.msra.mxu0 %v2651_v14  ;;  %2563 = vmatpush1.bf16.msra.mxu1 %v2651_v14  ;;  %v591_v32 = vor.u32 %v590_v26, %v586_v20  ;;  %v2668_v45 = vld [vmem:[%s3097_s26 + $0xa0] ss:$8 sps:$4 sm:$0xff]   ;;  %v2676_v49 = vld [vmem:[%s3097_s26 + $0x94] ss:$8 sps:$4 sm:$0xff]   ;;  %v2674_v53 = vld [vmem:[%s3097_s26 + $0x90] ss:$8 sps:$4 sm:$0xff]   ;;  %v604_v54 = vsel %vm584_vm0, %v599_v47, %v603_v33  ;;  %v881_v11 = vsel %vm876_vm2, %v878_v61, %v880_v6 }
  0x56   : > { %683 = vmatprep.subr.bf16.mxu0 %v2652_v17  ;;  %2560 = vmatprep.subr.bf16.mxu1 %v2652_v17  ;;  %v612_v42 = vsel %vm584_vm0, %v607_v36, %v611_v35  ;;  %v863_v50 = vld [vmem:[%s3105_s5] sm:$0xe]  ;;  %v2679_v55 = vld [vmem:[%s3097_s26 + $0x4] ss:$8 sps:$4 sm:$0xff]   ;;  %v2686_v62 = vld [vmem:[%s3097_s26 + $0xf4] ss:$8 sps:$4 sm:$0xff]  }
  0x57   : > { %v596_v38 = vsel %vm584_vm0, %v591_v32, %v595_v29  ;;  %v2393_v56 = vcombine.low %v863_v50, %v3112_v16  ;;  %v2682_v57 = vld [vmem:[%s3097_s26 + $0x84] ss:$8 sps:$4 sm:$0xff]   ;;  %v2677_v58 = vld [vmem:[%s3097_s26] ss:$8 sps:$4 sm:$0xff]   ;;  %v2689_v63 = vld [vmem:[%s3097_s26 + $0x134] ss:$8 sps:$4 sm:$0xff]  }
  0x58   : > { %v2680_v59 = vld [vmem:[%s3097_s26 + $0x80] ss:$8 sps:$4 sm:$0xff]   ;;  %v2684_v1 = vld [vmem:[%s3097_s26 + $0xf0] ss:$8 sps:$4 sm:$0xff]   ;;  %v2692_v3 = vld [vmem:[%s3097_s26 + $0xe4] ss:$8 sps:$4 sm:$0xff]  }
  0x59   : > { %684 = vmatpush1.bf16.msra.mxu0 %v2654_v25  ;;  %2564 = vmatpush1.bf16.msra.mxu1 %v2654_v25  ;;  %v877_v60 = vrot.slane %v2393_v56, 1  ;;  %v2687_v2 = vld [vmem:[%s3097_s26 + $0x130] ss:$8 sps:$4 sm:$0xff]   ;;  %v2695_v4 = vld [vmem:[%s3097_s26 + $0x124] ss:$8 sps:$4 sm:$0xff]   ;;  %v882_v16 = vrot.slane %v3128_v24, 1 }
  0x5a   : > { %800 = vmatprep.subr.bf16.mxu1 %v2661_v31  ;;  %944 = vmatprep.subr.bf16.mxu0 %v2664_v34  ;;  %v2690_v5 = vld [vmem:[%s3097_s26 + $0xe0] ss:$8 sps:$4 sm:$0xff]   ;;  %v2698_v9 = vld [vmem:[%s3097_s26 + $0xd4] ss:$8 sps:$4 sm:$0xff]   ;;  %v2696_v12 = vld [vmem:[%s3097_s26 + $0xd0] ss:$8 sps:$4 sm:$0xff]  }
  0x5b   : > { %v879_v0 = vsel %vm876_vm2, %v877_v60, %v878_v61  ;;  %v2693_v7 = vld [vmem:[%s3097_s26 + $0x120] ss:$8 sps:$4 sm:$0xff]   ;;  %v2701_v10 = vld [vmem:[%s3097_s26 + $0x114] ss:$8 sps:$4 sm:$0xff]   ;;  %v2699_v13 = vld [vmem:[%s3097_s26 + $0x110] ss:$8 sps:$4 sm:$0xff]   ;;  %v883_v26 = vsel %vm876_vm2, %v880_v6, %v882_v16 }
  0x5c   : > { %2368 = vmatmul.mubr.msk.bf16.vlgmr.msra.gmra.mxu0 %vm656_vm1, %v596_v38  ;;  %2370 = vmatmul.mubr.msk.bf16.vlgmr.msra.gmra.mxu1 %vm656_vm1, %v612_v42  ;;  %v2705_v14 = vld [vmem:[%s3097_s26 + $0xc4] ss:$8 sps:$4 sm:$0xff]   ;;  %v2703_v20 = vld [vmem:[%s3097_s26 + $0xc0] ss:$8 sps:$4 sm:$0xff]   ;;  %v2717_v22 = vld [vmem:[%s3097_s26 + $0x1b4] ss:$8 sps:$4 sm:$0xff]  }
  0x5d   : > { %801 = vmatpush1.bf16.msra.mxu1 %v2659_v37  ;;  %945 = vmatpush1.bf16.msra.mxu0 %v2662_v39  ;;  %v2708_v15 = vld [vmem:[%s3097_s26 + $0x104] ss:$8 sps:$4 sm:$0xff]   ;;  %v2706_v21 = vld [vmem:[%s3097_s26 + $0x100] ss:$8 sps:$4 sm:$0xff]   ;;  %v3206_v28 = vld [vmem:[%s3105_s5 + $0x10] sm:$0xf] }
  0x5e   : > { %802 = vmatprep.subr.bf16.mxu1 %v2667_v40  ;;  %946 = vmatprep.subr.bf16.mxu0 %v2670_v43  ;;  %v1021_v17 = vld [vmem:[%s3105_s5 + $0x4] sm:$0xc]  ;;  %v3202_v27 = vld [vmem:[%s3105_s5 + $0xc] sm:$0xff]   ;;  %v3212_v30 = vld [vmem:[%s3105_s5 + $0x14] sm:$0xff]   ;;  %s525_s10 = sand.u32 1, %s2807_s12   ;;  %s2569_s21 = smul.u32 (%p2929_p9), 28, %s2827_s17 }
  0x5f   : > { %711 = vmatprep.mubr.bf16.mxu0 %v2841_v8  ;;  %731 = vmatprep.mubr.bf16.mxu1 %v2841_v8  ;;  %v1565_v24 = vld [vmem:[%s3105_s5 + $0xc] sm:$0xe]  ;;  %v1231_v33 = vld [vmem:[%s3105_s5 + $0x4] sm:$0x8]  ;;  %v1068_v34 = vshrl.u32 %v3202_v27, 16  ;;  %v1071_v35 = vshll.u32 %v3202_v27, 16 }
  0x60   : > { %v3209_v29 = vcombine.low %v1565_v24, %v3206_v28  ;;  %v1600_v37 = vrot.slane %v3212_v30, 1  ;;  %v3228_v38 = vld [vmem:[%s3105_s5 + $0x1c] sm:$0xff]   ;;  %v2702_v39 = vld [vmem:[%s3105_s5 + $0x18] ss:$0 sps:$4 sm:$0x33]   ;;  %s3557_s12 = smul.u32 56, %s525_s10  ;;  %s2187_s24 = sadd.s32 (%p2929_p9), %s2569_s21, %s3490_s6 }
  0x61   : > { %803 = vmatpush1.bf16.msra.mxu1 %v2665_v44  ;;  %947 = vmatpush1.bf16.msra.mxu0 %v2668_v45  ;;  %v1070_v43 = vrot.slane %v1068_v34, 2  ;;  %v1073_v44 = vrot.slane %v1071_v35, 3  ;;  %v3238_v45 = vld [vmem:[%s3105_s5 + $0x14] sm:$0xff]   ;;  %v1602_v46 = vrot.slane %v3228_v38, 1  ;;  %v3257_v56 = vld [vmem:[%s3105_s5 + $0x1c] sm:$0xf] }
  0x62   : > { %804 = vmatprep.subr.bf16.mxu1 %v2673_v48  ;;  %948 = vmatprep.subr.bf16.mxu0 %v2676_v49  ;;  %v1599_v36 = vrot.slane %v3209_v29, 1  ;;  %v3245_v48 = vld [vmem:[%s3105_s5 + $0x24] ss:$0 sps:$4 sm:$0x77]   ;;  %v2712_v61 = vld [vmem:[%s3097_s26 + $0x170] ss:$8 sps:$4 sm:$0xff]  }
  0x63   : > { %v3242_v47 = vsel %vm876_vm2, %v1600_v37, %v1602_v46  ;;  %v1248_v6 = vrot.slane %v3238_v45, 3  ;;  %v2742_v24 = vld [vmem:[%s3097_s26 + $0x1f4] ss:$8 sps:$4 sm:$0xff]   ;;  %s3579_s11 = scalar_lea.vmem [#allocation3], %s3557_s12  ;;  %s2546_s30 = sshll.u32 (%p2929_p9), %s2187_s24, 2 }
  0x64   : > { %2369 = vmatmul.mubr.msk.bf16.gmra.mxu0 %vm656_vm1, %v604_v54  ;;  %2371 = vmatmul.mubr.msk.bf16.gmra.mxu1 %vm656_vm1, %v615_v51  ;;  %v1246_v51 = vrot.slane %v3202_v27, 3  ;;  %v1080_v54 = vshll.u32 %v3238_v45, 16  ;;  %v2740_v27 = vld [vmem:[%s3097_s26 + $0x1f0] ss:$8 sps:$4 sm:$0xff]   ;;  %s2189_s28 = scalar_lea.vmem (%p2929_p9), %s3655_s3, %s2546_s30 }
  0x65   : > { %805 = vmatpush1.bf16.msra.mxu1 %v2671_v52  ;;  %949 = vmatpush1.bf16.msra.mxu0 %v2674_v53  ;;  %v1074_v52 = vor.u32 %v1073_v44, %v1070_v43  ;;  %v1077_v53 = vshrl.u32 %v3238_v45, 16  ;;  %v1412_v43 = vrot.slane %v1071_v35, 4 }
  0x66   : > { %806 = vmatprep.subr.bf16.mxu1 %v2679_v55  ;;  %950 = vmatprep.subr.bf16.mxu0 %v2682_v57  ;;  %v1604_v55 = vrot.slane %v3245_v48, 1  ;;  %v1028_v57 = vld [vmem:[%s3105_s5 + $0x20] sm:$0x1] }
  0x67   : > { %824 = vmatprep.mubr.bf16.mxu1 %v2841_v8  ;;  %968 = vmatprep.mubr.bf16.mxu0 %v2841_v8  ;;  %v1415_v35 = vrot.slane %v1077_v53, 3 }
  0x69   : > { %807 = vmatpush1.bf16.msra.mxu1 %v2677_v58  ;;  %951 = vmatpush1.bf16.msra.mxu0 %v2680_v59  ;;  %v3263_v58 = vsel %vm876_vm2, %v1602_v46, %v1604_v55  ;;  %v1389_v46 = vld [vmem:[%s3105_s5 + $0x20] sm:$0x3] }
  0x6a   : > { %1154 = vmatprep.subr.bf16.mxu1 %v2686_v62  ;;  %1312 = vmatprep.subr.bf16.mxu0 %v2689_v63  ;;  %v2715_v62 = vld [vmem:[%s3097_s26 + $0x1b0] ss:$8 sps:$4 sm:$0xff]   ;;  %v1079_v63 = vrot.slane %v1077_v53, 2  ;;  %v2750_v53 = vld [vmem:[%s3097_s26 + $0x220] ss:$8 sps:$4 sm:$0xff]  }
  0x6c   : > { %2381 = vmatmul.mubr.msk.bf16.vlgmr.msra.gmra.mxu1 %vm656_vm1, %v3116_v18  ;;  %2402 = vmatmul.mubr.msk.bf16.vlgmr.msra.gmra.mxu0 %vm656_vm1, %v879_v0  ;;  %v1022_v18 = vld [vmem:[%s3105_s5 + $0x8] sm:$0xf]  ;;  %v1082_v0 = vrot.slane %v1080_v54, 3 }
  0x6d   : > { %1155 = vmatpush1.bf16.msra.mxu1 %v2684_v1  ;;  %1313 = vmatpush1.bf16.msra.mxu0 %v2687_v2  ;;  %v2414_v25 = vcombine.low %v1021_v17, %v1022_v18  ;;  %v3231_v42 = vcombine.low %v1231_v33, %v1022_v18  ;;  %v3274_v1 = vcombine.low %v3257_v56, %v1028_v57  ;;  %v2721_v2 = vld [vmem:[%s3097_s26 + $0x164] ss:$8 sps:$4 sm:$0xff]   ;;  %v2726_v17 = vld [vmem:[%s3097_s26 + $0x150] ss:$8 sps:$4 sm:$0xff]  }
  0x6e   : > { %834 = vmatprep.mubr.bf16.mxu1 %v2841_v8  ;;  %978 = vmatprep.mubr.bf16.mxu0 %v2841_v8  ;;  %v2729_v18 = vld [vmem:[%s3097_s26 + $0x190] ss:$8 sps:$4 sm:$0xff]   ;;  %v2752_v57 = vld [vmem:[%s3097_s26 + $0x224] ss:$8 sps:$4 sm:$0xff]  }
  0x6f   : > { %1156 = vmatprep.subr.bf16.mxu1 %v2692_v3  ;;  %1314 = vmatprep.subr.bf16.mxu0 %v2695_v4  ;;  %v1060_v31 = vshrl.u32 %v2414_v25, 16  ;;  %v1063_v32 = vshll.u32 %v2414_v25, 16  ;;  %v1245_v50 = vrot.slane %v3231_v42, 3  ;;  %v2724_v3 = vld [vmem:[%s3097_s26 + $0x1a4] ss:$8 sps:$4 sm:$0xff]  }
  0x70   : > { %v2719_v4 = vld [vmem:[%s3097_s26 + $0x160] ss:$8 sps:$4 sm:$0xff]  }
  0x71   : > { %1157 = vmatpush1.bf16.msra.mxu1 %v2690_v5  ;;  %1315 = vmatpush1.bf16.msra.mxu0 %v2693_v7  ;;  %v1062_v40 = vrot.slane %v1060_v31, 2  ;;  %v1065_v41 = vrot.slane %v1063_v32, 3  ;;  %v1247_v59 = vsel %vm1244_vm4, %v1245_v50, %v1246_v51  ;;  %v1083_v5 = vor.u32 %v1082_v0, %v1079_v63  ;;  %v2722_v7 = vld [vmem:[%s3097_s26 + $0x1a0] ss:$8 sps:$4 sm:$0xff]   ;;  %v2745_v31 = vld [vmem:[%s3097_s26 + $0x234] ss:$8 sps:$4 sm:$0xff]  }
  0x72   : > { %1158 = vmatprep.subr.bf16.mxu1 %v2698_v9  ;;  %1316 = vmatprep.subr.bf16.mxu0 %v2701_v10  ;;  %v1086_v9 = vshrl.u32 %v3274_v1, 16  ;;  %v1089_v10 = vshll.u32 %v3274_v1, 16  ;;  %v2732_v25 = vld [vmem:[%s3097_s26 + $0x140] ss:$8 sps:$4 sm:$0xff]   ;;  %v1416_v50 = vrot.slane %v1080_v54, 4 }
  0x73   : > { %v1066_v49 = vor.u32 %v1065_v41, %v1062_v40  ;;  %v1411_v41 = vrot.slane %v1068_v34, 3  ;;  %v2757_v54 = vld [vmem:[%s3097_s26 + $0x1d4] ss:$8 sps:$4 sm:$0xff]   ;;  %v2755_v0 = vld [vmem:[%s3097_s26 + $0x1d0] ss:$8 sps:$4 sm:$0xff]  }
  0x74   : > { %2382 = vmatmul.mubr.msk.bf16.gmra.mxu1 %vm656_vm1, %v3119_v19  ;;  %2403 = vmatmul.mubr.msk.bf16.gmra.mxu0 %vm656_vm1, %v881_v11  ;;  %v2714_v19 = vld [vmem:[%s3097_s26 + $0x174] ss:$8 sps:$4 sm:$0xff]  }
  0x75   : > { %844 = vmatprep.mubr.bf16.mxu1 %v2841_v8  ;;  %988 = vmatprep.mubr.bf16.mxu0 %v2841_v8  ;;  %v1075_v60 = vsel %vm1058_vm3, %v1066_v49, %v1074_v52  ;;  %v2728_v11 = vld [vmem:[%s3097_s26 + $0x154] ss:$8 sps:$4 sm:$0xff]   ;;  %v2743_v49 = vld [vmem:[%s3097_s26 + $0x230] ss:$8 sps:$4 sm:$0xff]  }
  0x76   : > { %1159 = vmatpush1.bf16.msra.mxu1 %v2696_v12  ;;  %1317 = vmatpush1.bf16.msra.mxu0 %v2699_v13  ;;  %v2731_v12 = vld [vmem:[%s3097_s26 + $0x194] ss:$8 sps:$4 sm:$0xff]   ;;  %v1084_v13 = vsel %vm1058_vm3, %v1074_v52, %v1083_v5  ;;  %v2749_v52 = vld [vmem:[%s3097_s26 + $0x1e4] ss:$8 sps:$4 sm:$0xff]  }
  0x77   : > { %1160 = vmatprep.subr.bf16.mxu1 %v2705_v14  ;;  %1318 = vmatprep.subr.bf16.mxu0 %v2708_v15  ;;  %v1249_v14 = vsel %vm1244_vm4, %v1246_v51, %v1248_v6  ;;  %v1088_v15 = vrot.slane %v1086_v9, 2  ;;  %v2459_v51 = vcombine.low %v3257_v56, %v1389_v46  ;;  %v2760_v56 = vld [vmem:[%s3097_s26 + $0x214] ss:$8 sps:$4 sm:$0xff]   ;;  %v1761_v9 = vshll.u32 %v3209_v29, 16 }
  0x79   : > { %v1420_v45 = vshrl.u32 %v2459_v51, 16 }
  0x7a   : > { %1161 = vmatpush1.bf16.msra.mxu1 %v2703_v20  ;;  %1319 = vmatpush1.bf16.msra.mxu0 %v2706_v21  ;;  %v2734_v20 = vld [vmem:[%s3097_s26 + $0x144] ss:$8 sps:$4 sm:$0xff]  }
  0x7b   : > { %1488 = vmatprep.subr.bf16.mxu1 %v2714_v19  ;;  %1666 = vmatprep.subr.bf16.mxu0 %v2717_v22  ;;  %v2737_v21 = vld [vmem:[%s3097_s26 + $0x184] ss:$8 sps:$4 sm:$0xff]   ;;  %v1250_v22 = vrot.slane %v3274_v1, 3  ;;  %v2758_v1 = vld [vmem:[%s3097_s26 + $0x210] ss:$8 sps:$4 sm:$0xff]  }
  0x7c   : > { %2383 = vmatmul.mubr.msk.bf16.gmra.mxu1 %vm656_vm1, %v3125_v23  ;;  %2404 = vmatmul.mubr.msk.bf16.gmra.mxu0 %vm656_vm1, %v883_v26  ;;  %v3225_v23 = vsel %vm876_vm2, %v1599_v36, %v1600_v37  ;;  %v2735_v26 = vld [vmem:[%s3097_s26 + $0x180] ss:$8 sps:$4 sm:$0xff]   ;;  %v1404_v36 = vshrl.u32 %v3231_v42, 16  ;;  %v1407_v37 = vshll.u32 %v3231_v42, 16  ;;  %v1413_v42 = vor.u32 %v1412_v43, %v1411_v41 }
  0x7d   : > { %854 = vmatprep.mubr.bf16.mxu1 %v2841_v8  ;;  %998 = vmatprep.mubr.bf16.mxu0 %v2841_v8  ;;  %v1251_v33 = vsel %vm1244_vm4, %v1248_v6, %v1250_v22  ;;  %v2764_v6 = vld [vmem:[%s3097_s26 + $0x200] ss:$8 sps:$4 sm:$0xff]  }
  0x7e   : > { %v1409_v40 = vrot.slane %v1407_v37, 4 }
  0x84   : > { %2384 = vmatmul.mubr.msk.bf16.gmra.mxu1 %vm656_vm1, %v2702_v39  ;;  %2405 = vmatmul.mubr.msk.bf16.gmra.mxu0 %vm656_vm1, %v882_v16  ;;  %v1091_v16 = vrot.slane %v1089_v10, 3  ;;  %v1406_v39 = vrot.slane %v1404_v36, 3  ;;  %v1766_v10 = vshrl.u32 %v3212_v30, 16 }
  0x85   : > { %1178 = vmatprep.mubr.bf16.mxu1 %v2841_v8  ;;  %1336 = vmatprep.mubr.bf16.mxu0 %v2841_v8 }
  0x86   : > { %v1092_v19 = vor.u32 %v1091_v16, %v1088_v15  ;;  %v1410_v44 = vor.u32 %v1409_v40, %v1406_v39  ;;  %v1768_v15 = vrot.slane %v1766_v10, 1 }
  0x88   : > { %v1093_v32 = vsel %vm1058_vm3, %v1083_v5, %v1092_v19  ;;  %v1414_v34 = vsel %vm1402_vm5, %v1410_v44, %v1413_v42  ;;  %v2761_v5 = vld [vmem:[%s3097_s26 + $0x1c0] ss:$8 sps:$4 sm:$0xff]  }
  0x8c   : > { %2426 = vmatmul.mubr.msk.bf16.vlgmr.msra.gmra.mxu1 %vm656_vm1, %v1075_v60  ;;  %2447 = vmatmul.mubr.msk.bf16.vlgmr.msra.gmra.mxu0 %vm656_vm1, %v1247_v59  ;;  %v1417_v59 = vor.u32 %v1416_v50, %v1415_v35  ;;  %v2747_v60 = vld [vmem:[%s3097_s26 + $0x1e0] ss:$8 sps:$4 sm:$0xff]  }
  0x8d   : > { %1489 = vmatpush1.bf16.msra.mxu1 %v2712_v61  ;;  %1667 = vmatpush1.bf16.msra.mxu0 %v2715_v62  ;;  %v1423_v61 = vshll.u32 %v2459_v51, 16  ;;  %v1422_v62 = vrot.slane %v1420_v45, 3 }
  0x8e   : > { %1188 = vmatprep.mubr.bf16.mxu1 %v2841_v8  ;;  %1346 = vmatprep.mubr.bf16.mxu0 %v2841_v8 }
  0x8f   : > { %1490 = vmatprep.subr.bf16.mxu1 %v2721_v2  ;;  %1668 = vmatprep.subr.bf16.mxu0 %v2724_v3  ;;  %v1425_v63 = vrot.slane %v1423_v61, 4  ;;  %v2763_v2 = vld [vmem:[%s3097_s26 + $0x1c4] ss:$8 sps:$4 sm:$0xff]  }
  0x90   : > { %v2766_v3 = vld [vmem:[%s3097_s26 + $0x204] ss:$8 sps:$4 sm:$0xff]  }
  0x91   : > { %1491 = vmatpush1.bf16.msra.mxu1 %v2719_v4  ;;  %1669 = vmatpush1.bf16.msra.mxu0 %v2722_v7  ;;  %v1426_v4 = vor.u32 %v1425_v63, %v1422_v62 }
  0x92   : > { %1492 = vmatprep.subr.bf16.mxu1 %v2728_v11  ;;  %1670 = vmatprep.subr.bf16.mxu0 %v2731_v12  ;;  %v1769_v11 = vshll.u32 %v3212_v30, 16  ;;  %v1929_v12 = vld [vmem:[%s3105_s5 + $0xc] sm:$0xc] }
  0x93   : > { %v1427_v7 = vsel %vm1402_vm5, %v1417_v59, %v1426_v4 }
  0x94   : > { %2427 = vmatmul.mubr.msk.bf16.gmra.mxu1 %vm656_vm1, %v1084_v13  ;;  %2448 = vmatmul.mubr.msk.bf16.gmra.mxu0 %vm656_vm1, %v1249_v14  ;;  %v1763_v14 = vrot.slane %v1761_v9, 2  ;;  %v1771_v16 = vrot.slane %v1769_v11, 2 }
  0x95   : > { %1198 = vmatprep.mubr.bf16.mxu1 %v2841_v8  ;;  %1356 = vmatprep.mubr.bf16.mxu0 %v2841_v8 }
  0x96   : > { %1493 = vmatpush1.bf16.msra.mxu1 %v2726_v17  ;;  %1671 = vmatpush1.bf16.msra.mxu0 %v2729_v18  ;;  %v2525_v17 = vcombine.low %v1929_v12, %v3206_v28  ;;  %v1772_v18 = vor.u32 %v1771_v16, %v1768_v15  ;;  %v1778_v28 = vshll.u32 %v3228_v38, 16 }
  0x97   : > { %1494 = vmatprep.subr.bf16.mxu1 %v2734_v20  ;;  %1672 = vmatprep.subr.bf16.mxu0 %v2737_v21  ;;  %v1775_v21 = vshrl.u32 %v3228_v38, 16 }
  0x98   : > { %v1943_v20 = vrot.slane %v2525_v17, 2 }
  0x9a   : > { %1495 = vmatpush1.bf16.msra.mxu1 %v2732_v25  ;;  %1673 = vmatpush1.bf16.msra.mxu0 %v2735_v26  ;;  %v2768_v25 = vld [vmem:[%s3105_s5 + $0x24] ss:$0 sps:$4 sm:$0xff]   ;;  %v1946_v26 = vrot.slane %v3228_v38, 2 }
  0x9b   : > { %1852 = vmatprep.subr.bf16.mxu1 %v2742_v24  ;;  %2010 = vmatprep.subr.bf16.mxu0 %v2745_v31  ;;  %v1784_v24 = vshrl.u32 %v2768_v25, 16  ;;  %v1787_v31 = vshll.u32 %v2768_v25, 16  ;;  %v1948_v40 = vrot.slane %v2768_v25, 2 }
  0x9c   : > { %2428 = vmatmul.mubr.msk.bf16.gmra.mxu1 %vm656_vm1, %v1093_v32  ;;  %2449 = vmatmul.mubr.msk.bf16.gmra.mxu0 %vm656_vm1, %v1251_v33 }
  0x9d   : > { %1208 = vmatprep.mubr.bf16.mxu1 %v2841_v8  ;;  %1366 = vmatprep.mubr.bf16.mxu0 %v2841_v8  ;;  %v1786_v36 = vrot.slane %v1784_v24, 1  ;;  %v1789_v37 = vrot.slane %v1787_v31, 2  ;;  %v1949_v41 = vsel %vm1942_vm7, %v1946_v26, %v1948_v40 }
  0x9f   : > { %v1790_v39 = vor.u32 %v1789_v37, %v1786_v36 }
  0xa4   : > { %2429 = vmatmul.mubr.msk.bf16.gmra.mxu1 %vm656_vm1, %v1092_v19  ;;  %2450 = vmatmul.mubr.msk.bf16.gmra.mxu0 %vm656_vm1, %v1250_v22  ;;  %v1780_v22 = vrot.slane %v1778_v28, 2 }
  0xa5   : > { %1512 = vmatprep.mubr.bf16.mxu1 %v2841_v8  ;;  %1690 = vmatprep.mubr.bf16.mxu0 %v2841_v8 }
  0xac   : > { %2468 = vmatmul.mubr.msk.bf16.vlgmr.msra.gmra.mxu1 %vm656_vm1, %v1414_v34  ;;  %2492 = vmatmul.mubr.msk.bf16.vlgmr.msra.gmra.mxu0 %vm656_vm1, %v3225_v23  ;;  %v1418_v23 = vsel %vm1402_vm5, %v1413_v42, %v1417_v59 }
  0xad   : > { %1853 = vmatpush1.bf16.msra.mxu1 %v2740_v27  ;;  %2011 = vmatpush1.bf16.msra.mxu0 %v2743_v49 }
  0xae   : > { %1522 = vmatprep.mubr.bf16.mxu1 %v2841_v8  ;;  %1700 = vmatprep.mubr.bf16.mxu0 %v2841_v8 }
  0xaf   : > { %1854 = vmatprep.subr.bf16.mxu1 %v2749_v52  ;;  %2012 = vmatprep.subr.bf16.mxu0 %v2752_v57 }
  0xb1   : > { %1855 = vmatpush1.bf16.msra.mxu1 %v2747_v60  ;;  %2013 = vmatpush1.bf16.msra.mxu0 %v2750_v53 }
  0xb2   : > { %1856 = vmatprep.subr.bf16.mxu1 %v2757_v54  ;;  %2014 = vmatprep.subr.bf16.mxu0 %v2760_v56 }
  0xb4   : > { %2469 = vmatmul.mubr.msk.bf16.gmra.mxu1 %vm656_vm1, %v1418_v23  ;;  %2493 = vmatmul.mubr.msk.bf16.gmra.mxu0 %vm656_vm1, %v3242_v47  ;;  %v1758_v47 = vshrl.u32 %v3209_v29, 16 }
  0xb5   : > { %1532 = vmatprep.mubr.bf16.mxu1 %v2841_v8  ;;  %1710 = vmatprep.mubr.bf16.mxu0 %v2841_v8 }
  0xb6   : > { %1857 = vmatpush1.bf16.msra.mxu1 %v2755_v0  ;;  %2015 = vmatpush1.bf16.msra.mxu0 %v2758_v1  ;;  %v1760_v13 = vrot.slane %v1758_v47, 1 }
  0xb7   : > { %1858 = vmatprep.subr.bf16.mxu1 %v2763_v2  ;;  %2016 = vmatprep.subr.bf16.mxu0 %v2766_v3 }
  0xb8   : > { %v1764_v29 = vor.u32 %v1763_v14, %v1760_v13 }
  0xba   : > { %1859 = vmatpush1.bf16.msra.mxu1 %v2761_v5  ;;  %2017 = vmatpush1.bf16.msra.mxu0 %v2764_v6  ;;  %v1773_v48 = vsel %vm1756_vm6, %v1764_v29, %v1772_v18 }
  0xbc   : > { %2470 = vmatmul.mubr.msk.bf16.gmra.mxu1 %vm656_vm1, %v1427_v7  ;;  %2494 = vmatmul.mubr.msk.bf16.gmra.mxu0 %vm656_vm1, %v3263_v58  ;;  %v1944_v58 = vrot.slane %v3212_v30, 2 }
  0xbd   : > { %1542 = vmatprep.mubr.bf16.mxu1 %v2841_v8  ;;  %1720 = vmatprep.mubr.bf16.mxu0 %v2841_v8 }
  0xbe   : > { %v1945_v19 = vsel %vm1942_vm7, %v1943_v20, %v1944_v58  ;;  %v1947_v33 = vsel %vm1942_vm7, %v1944_v58, %v1946_v26 }
  0xc4   : > { %2471 = vmatmul.mubr.msk.bf16.gmra.mxu1 %vm656_vm1, %v1426_v4  ;;  %2495 = vmatmul.mubr.msk.bf16.gmra.mxu0 %vm656_vm1, %v1604_v55  ;;  %v1777_v55 = vrot.slane %v1775_v21, 1 }
  0xc5   : > { %1876 = vmatprep.mubr.bf16.mxu1 %v2841_v8  ;;  %2034 = vmatprep.mubr.bf16.mxu0 %v2841_v8 }
  0xc6   : > { %v1781_v30 = vor.u32 %v1780_v22, %v1777_v55 }
  0xc8   : > { %v1782_v32 = vsel %vm1756_vm6, %v1772_v18, %v1781_v30  ;;  %v1791_v38 = vsel %vm1756_vm6, %v1781_v30, %v1790_v39 }
  0xcc   : > { %2513 = vmatmul.mubr.msk.bf16.vlgmr.msra.gmra.mxu1 %vm656_vm1, %v1773_v48  ;;  %2534 = vmatmul.mubr.msk.bf16.vlgmr.msra.gmra.mxu0 %vm656_vm1, %v1945_v19 }
  0xcd   : > { %1886 = vmatprep.mubr.bf16.mxu1 %v2841_v8  ;;  %2044 = vmatprep.mubr.bf16.mxu0 %v2841_v8 }
  0xd4   : > { %2514 = vmatmul.mubr.msk.bf16.gmra.mxu1 %vm656_vm1, %v1782_v32  ;;  %2535 = vmatmul.mubr.msk.bf16.gmra.mxu0 %vm656_vm1, %v1947_v33 }
  0xd5   : > { %1896 = vmatprep.mubr.bf16.mxu1 %v2841_v8  ;;  %2054 = vmatprep.mubr.bf16.mxu0 %v2841_v8 }
  0xdc   : > { %2515 = vmatmul.mubr.msk.bf16.gmra.mxu1 %vm656_vm1, %v1791_v38  ;;  %2536 = vmatmul.mubr.msk.bf16.gmra.mxu0 %vm656_vm1, %v1949_v41 }
  0xdd   : > { %1906 = vmatprep.mubr.bf16.mxu1 %v2841_v8  ;;  %2064 = vmatprep.mubr.bf16.mxu0 %v2841_v8 }
  0xe4   : > { %2516 = vmatmul.mubr.msk.bf16.gmra.mxu1 %vm656_vm1, %v1790_v39  ;;  %2537 = vmatmul.mubr.msk.bf16.gmra.mxu0 %vm656_vm1, %v1948_v40 }
 0x11c   : > { %v703_v43 = vpop.f32.mrf.mxu0  ;;  %v723_v44 = vpop.f32.mrf.mxu1 }
 0x11e   : > { %v705_v42 = vpop.f32.mrf.mxu0  ;;  %v725_v46 = vpop.f32.mrf.mxu1 }
 0x120   : > { %v707_v34 = vpop.f32.mrf.mxu0  ;;  %v727_v27 = vpop.f32.mrf.mxu1 }
 0x122   : > { %v709_v49 = vpop.f32.mrf.mxu0  ;;  %v729_v35 = vpop.f32.mrf.mxu1 }
 0x124   : > { %v713_v50 = vpop.f32.mrf.mxu0  ;;  %v733_v51 = vpop.f32.mrf.mxu1 }
 0x126   : > { %v715_v52 = vpop.f32.mrf.mxu0  ;;  %v735_v57 = vpop.f32.mrf.mxu1 }
 0x128   : > { %v717_v59 = vpop.f32.mrf.mxu0  ;;  %v737_v60 = vpop.f32.mrf.mxu1 }
 0x12a   : > { %v719_v53 = vpop.f32.mrf.mxu0  ;;  %v738_v8 = vpop.f32.mrf.mxu1 }
 0x12c   : > { %v826_v45 = vpop.f32.mrf.mxu1  ;;  %v970_v61 = vpop.f32.mrf.mxu0 }
 0x12d   : > { %v827_v54 = vadd.f32 %v826_v45, %v703_v43 }
 0x12e   : > { %v828_v56 = vpop.f32.mrf.mxu1  ;;  %v972_v23 = vpop.f32.mrf.mxu0 }
 0x12f   : > { %v3395_v62 = vadd.f32 %v970_v61, %v827_v54  ;;  %v829_v63 = vadd.f32 %v828_v56, %v705_v42 }
 0x130   : > { %v830_v0 = vpop.f32.mrf.mxu1  ;;  %v974_v1 = vpop.f32.mrf.mxu0 }
 0x131   : > { %v3397_v2 = vadd.f32 %v972_v23, %v829_v63  ;;  %v831_v3 = vadd.f32 %v830_v0, %v707_v34 }
 0x132   : > { %v832_v4 = vpop.f32.mrf.mxu1  ;;  %v976_v5 = vpop.f32.mrf.mxu0 }
 0x133   : > { %v3399_v6 = vadd.f32 %v974_v1, %v831_v3  ;;  %v833_v7 = vadd.f32 %v832_v4, %v709_v49 }
 0x134   : > { %v836_v47 = vpop.f32.mrf.mxu1  ;;  %v980_v9 = vpop.f32.mrf.mxu0 }
 0x135   : > { %v3401_v10 = vadd.f32 %v976_v5, %v833_v7  ;;  %v837_v11 = vadd.f32 %v836_v47, %v713_v50 }
 0x136   : > { %v838_v12 = vpop.f32.mrf.mxu1  ;;  %v982_v13 = vpop.f32.mrf.mxu0 }
 0x137   : > { %v3403_v14 = vadd.f32 %v980_v9, %v837_v11  ;;  %v839_v15 = vadd.f32 %v838_v12, %v715_v52 }
 0x138   : > { %v840_v16 = vpop.f32.mrf.mxu1  ;;  %v984_v17 = vpop.f32.mrf.mxu0 }
 0x139   : > { %v3405_v29 = vadd.f32 %v982_v13, %v839_v15  ;;  %v841_v58 = vadd.f32 %v840_v16, %v717_v59 }
 0x13a   : > { %v842_v18 = vpop.f32.mrf.mxu1  ;;  %v986_v20 = vpop.f32.mrf.mxu0 }
 0x13b   : > { %v3407_v21 = vadd.f32 %v984_v17, %v841_v58  ;;  %v843_v28 = vadd.f32 %v842_v18, %v719_v53 }
 0x13c   : > { %v846_v48 = vpop.f32.mrf.mxu1  ;;  %v990_v19 = vpop.f32.mrf.mxu0 }
 0x13d   : > { %v3409_v55 = vadd.f32 %v986_v20, %v843_v28  ;;  %v847_v22 = vadd.f32 %v846_v48, %v723_v44 }
 0x13e   : > { %v848_v25 = vpop.f32.mrf.mxu1  ;;  %v992_v30 = vpop.f32.mrf.mxu0 }
 0x13f   : > { %v3411_v26 = vadd.f32 %v990_v19, %v847_v22  ;;  %v849_v24 = vadd.f32 %v848_v25, %v725_v46 }
 0x140   : > { %v850_v31 = vpop.f32.mrf.mxu1  ;;  %v994_v32 = vpop.f32.mrf.mxu0 }
 0x141   : > { %v3413_v33 = vadd.f32 %v992_v30, %v849_v24  ;;  %v851_v36 = vadd.f32 %v850_v31, %v727_v27 }
 0x142   : > { %v852_v37 = vpop.f32.mrf.mxu1  ;;  %v996_v39 = vpop.f32.mrf.mxu0 }
 0x143   : > { %v3415_v40 = vadd.f32 %v994_v32, %v851_v36  ;;  %v853_v38 = vadd.f32 %v852_v37, %v729_v35 }
 0x144   : > { %v856_v41 = vpop.f32.mrf.mxu1  ;;  %v1000_v43 = vpop.f32.mrf.mxu0 }
 0x145   : > { %v3417_v42 = vadd.f32 %v996_v39, %v853_v38  ;;  %v857_v44 = vadd.f32 %v856_v41, %v733_v51 }
 0x146   : > { %v858_v34 = vpop.f32.mrf.mxu1  ;;  %v1002_v49 = vpop.f32.mrf.mxu0 }
 0x147   : > { %v3419_v50 = vadd.f32 %v1000_v43, %v857_v44  ;;  %v859_v46 = vadd.f32 %v858_v34, %v735_v57 }
 0x148   : > { %v860_v52 = vpop.f32.mrf.mxu1  ;;  %v1004_v59 = vpop.f32.mrf.mxu0 }
 0x149   : > { %v3421_v60 = vadd.f32 %v1002_v49, %v859_v46 }
 0x14a   : > { %v861_v27 = vpop.f32.mrf.mxu1  ;;  %v1005_v53 = vpop.f32.mrf.mxu0 }
 0x14b   : > { %3657 = vst [vmem:[#allocation4_spill] sm:$0xff] %v3421_v60 }
 0x14c   : > { %v1180_v8 = vpop.f32.mrf.mxu1  ;;  %v3423_v45 = vpop.f32.mrf.mxu0 }
 0x14e   : > { %v1182_v35 = vpop.f32.mrf.mxu1  ;;  %v3425_v61 = vpop.f32.mrf.mxu0 }
 0x150   : > { %v1184_v54 = vpop.f32.mrf.mxu1  ;;  %v3427_v56 = vpop.f32.mrf.mxu0 }
 0x152   : > { %v3429_v51 = vpop.f32.mrf.mxu1  ;;  %v3431_v23 = vpop.f32.mrf.mxu0 }
 0x154   : > { %v3433_v57 = vpop.f32.mrf.mxu1  ;;  %v3435_v63 = vpop.f32.mrf.mxu0 }
 0x156   : > { %v3437_v0 = vpop.f32.mrf.mxu1  ;;  %v3439_v1 = vpop.f32.mrf.mxu0 }
 0x158   : > { %v3441_v3 = vpop.f32.mrf.mxu1  ;;  %v3443_v4 = vpop.f32.mrf.mxu0 }
 0x15a   : > { %v3445_v5 = vpop.f32.mrf.mxu1  ;;  %v3447_v7 = vpop.f32.mrf.mxu0 }
 0x15c   : > { %v3449_v47 = vpop.f32.mrf.mxu1  ;;  %v3451_v9 = vpop.f32.mrf.mxu0 }
 0x15e   : > { %v3453_v11 = vpop.f32.mrf.mxu1  ;;  %v3455_v12 = vpop.f32.mrf.mxu0 }
 0x160   : > { %v3457_v13 = vpop.f32.mrf.mxu1  ;;  %v3459_v15 = vpop.f32.mrf.mxu0 }
 0x162   : > { %v3461_v16 = vpop.f32.mrf.mxu1  ;;  %v3463_v17 = vpop.f32.mrf.mxu0 }
 0x163   : > { %3658 = vst [vmem:[#allocation5_spill] sm:$0xff] %v3463_v17 }
 0x164   : > { %v3465_v58 = vpop.f32.mrf.mxu1  ;;  %v3467_v18 = vpop.f32.mrf.mxu0 }
 0x165   : > { %3659 = vst [vmem:[#allocation6_spill] sm:$0xff] %v3465_v58  ;;  %3660 = vst [vmem:[#allocation7_spill] sm:$0xff] %v3467_v18  ;;  %v1217_v18 = vadd.f32 %v1180_v8, %v3395_v62 }
 0x166   : > { %v3469_v20 = vpop.f32.mrf.mxu1  ;;  %v3471_v28 = vpop.f32.mrf.mxu0 }
 0x167   : > { %3661 = vst [vmem:[#allocation8_spill] sm:$0xff] %v3469_v20  ;;  %3662 = vst [vmem:[#allocation9_spill] sm:$0xff] %v3471_v28  ;;  %v2089_v28 = vlaneseq  ;;  %v1218_v20 = vadd.f32 %v1182_v35, %v3397_v2  ;;  %v1375_v60 = vadd.f32 %v3423_v45, %v1217_v18  ;;  %v1220_v2 = vadd.f32 %v3429_v51, %v3401_v10  ;;  %v2087_v18 = vld [vmem:[%s537_s9] sm:$0x3] }
 0x168   : > { %v1214_v48 = vpop.f32.mrf.mxu1  ;;  %v1372_v19 = vpop.f32.mrf.mxu0  ;;  %v1222_v10 = vadd.f32 %v3437_v0, %v3405_v29 }
 0x169   : > { %v1376_v62 = vadd.f32 %v3425_v61, %v1218_v20 }
 0x16a   : > { %v1215_v22 = vpop.f32.mrf.mxu1  ;;  %v1373_v25 = vpop.f32.mrf.mxu0 }
 0x16c   : > { %v1514_v30 = vpop.f32.mrf.mxu1  ;;  %v1692_v24 = vpop.f32.mrf.mxu0 }
 0x16d   : > { %v1551_v8 = vadd.f32 %v1514_v30, %v1375_v60  ;;  %v1223_v60 = vadd.f32 %v3441_v3, %v3407_v21 }
 0x16e   : > { %v1516_v31 = vpop.f32.mrf.mxu1  ;;  %v1694_v32 = vpop.f32.mrf.mxu0 }
 0x16f   : > { %v1729_v61 = vadd.f32 %v1692_v24, %v1551_v8 }
 0x170   : > { %v1518_v36 = vpop.f32.mrf.mxu1  ;;  %v1696_v37 = vpop.f32.mrf.mxu0 }
 0x172   : > { %v1520_v39 = vpop.f32.mrf.mxu1  ;;  %v3473_v38 = vpop.f32.mrf.mxu0 }
 0x174   : > { %v1524_v41 = vpop.f32.mrf.mxu1  ;;  %v3475_v43 = vpop.f32.mrf.mxu0 }
 0x176   : > { %v3477_v44 = vpop.f32.mrf.mxu1  ;;  %v3479_v34 = vpop.f32.mrf.mxu0 }
 0x178   : > { %v3481_v49 = vpop.f32.mrf.mxu1  ;;  %v3483_v46 = vpop.f32.mrf.mxu0 }
 0x17a   : > { %v3485_v52 = vpop.f32.mrf.mxu1  ;;  %v3487_v59 = vpop.f32.mrf.mxu0 }
 0x17b   : > { %3663 = vst [vmem:[#allocation10_spill] sm:$0xff] %v3487_v59 }
 0x17c   : > { %v3492_v27 = vpop.f32.mrf.mxu1  ;;  %v3494_v53 = vpop.f32.mrf.mxu0 }
 0x17d   : > { %3664 = vst [vmem:[#allocation11_spill] sm:$0xff] %v3494_v53 }
 0x17e   : > { %v3496_v48 = vpop.f32.mrf.mxu1  ;;  %v3498_v19 = vpop.f32.mrf.mxu0 }
 0x17f   : > { %3665 = vst [vmem:[#allocation12_spill] sm:$0xff] %v3496_v48  ;;  %3666 = vst [vmem:[#allocation13_spill] sm:$0xff] %v3498_v19  ;;  %v2090_v19 = vshrl.u32 %v2089_v28, 7 }
 0x180   : > { %v3501_v22 = vpop.f32.mrf.mxu1  ;;  %v3503_v25 = vpop.f32.mrf.mxu0 }
 0x181   : > { %3667 = vst [vmem:[#allocation14_spill] sm:$0xff] %v3501_v22  ;;  %3668 = vst [vmem:[#allocation15_spill] sm:$0xff] %v3503_v25  ;;  %v1219_v22 = vadd.f32 %v1184_v54, %v3399_v6  ;;  %v1221_v6 = vadd.f32 %v3433_v57, %v3403_v14  ;;  %v1552_v54 = vadd.f32 %v1516_v31, %v1376_v62 }
 0x182   : > { %v3506_v17 = vpop.f32.mrf.mxu1  ;;  %v3508_v59 = vpop.f32.mrf.mxu0 }
 0x183   : > { %3669 = vst [vmem:[#allocation16_spill] sm:$0xff] %v3508_v59  ;;  %v1377_v45 = vadd.f32 %v3427_v56, %v1219_v22  ;;  %v1379_v14 = vadd.f32 %v3435_v63, %v1221_v6  ;;  %v1730_v57 = vadd.f32 %v1694_v32, %v1552_v54  ;;  %v1225_v63 = vadd.f32 %v3449_v47, %v3411_v26 }
 0x184   : > { %v3512_v53 = vpop.f32.mrf.mxu1  ;;  %v3514_v48 = vpop.f32.mrf.mxu0  ;;  %v1226_v32 = vadd.f32 %v3453_v11, %v3413_v33  ;;  %v1228_v6 = vadd.f32 %v3461_v16, %v3417_v42  ;;  %v3677_v42 = vld [vmem:[#allocation10_spill] sm:$0xff] }
 0x185   : > { %3670 = vst [vmem:[#allocation17_spill] sm:$0xff] %v3512_v53  ;;  %3671 = vst [vmem:[#allocation18_spill] sm:$0xff] %v3514_v48  ;;  %v2091_v48 = vsub.s32 0, %v2090_v19  ;;  %v1378_v53 = vadd.f32 %v3431_v23, %v1220_v2  ;;  %v1553_v20 = vadd.f32 %v1518_v36, %v1377_v45  ;;  %v1224_v23 = vadd.f32 %v3445_v5, %v3409_v55 }
 0x186   : > { %v3518_v25 = vpop.f32.mrf.mxu1  ;;  %v3520_v58 = vpop.f32.mrf.mxu0  ;;  %v1555_v0 = vadd.f32 %v1524_v41, %v1379_v14  ;;  %v1383_v2 = vadd.f32 %v3451_v9, %v1225_v63 }
 0x187   : > { %3672 = vst [vmem:[#allocation19_spill] sm:$0xff] %v3518_v25  ;;  %3673 = vst [vmem:[#allocation20_spill] sm:$0xff] %v3520_v58  ;;  %v2095_v25 = vsub.s32 1, %v2090_v19  ;;  %v3536_v30 = vrot.slane %v2087_v18, %v2091_v48  ;;  %v1731_v29 = vadd.f32 %v1696_v37, %v1553_v20  ;;  %v1380_v48 = vadd.f32 %v3439_v1, %v1222_v10 }
 0x188   : > { %v1548_v35 = vpop.f32.mrf.mxu1  ;;  %v1726_v28 = vpop.f32.mrf.mxu0  ;;  %v1381_v19 = vadd.f32 %v3443_v4, %v1223_v60  ;;  %v1382_v22 = vadd.f32 %v3447_v7, %v1224_v23  ;;  %v1227_v1 = vadd.f32 %v3457_v13, %v3415_v40  ;;  %v1733_v11 = vadd.f32 %v3475_v43, %v1555_v0  ;;  %v3674_v60 = vld [vmem:[#allocation6_spill] sm:$0xff] }
 0x189   : > { %v1556_v4 = vadd.f32 %v3477_v44, %v1380_v48  ;;  %v1384_v7 = vadd.f32 %v3455_v12, %v1226_v32  ;;  %v3680_v48 = vld [vmem:[#allocation11_spill] sm:$0xff] }
 0x18a   : > { %v1549_v58 = vpop.f32.mrf.mxu1  ;;  %v1727_v59 = vpop.f32.mrf.mxu0  ;;  %v1557_v26 = vadd.f32 %v3481_v49, %v1381_v19  ;;  %v1558_v40 = vadd.f32 %v3485_v52, %v1382_v22  ;;  %v1385_v43 = vadd.f32 %v3459_v15, %v1227_v1  ;;  %v3675_v15 = vld [vmem:[#allocation4_spill] sm:$0xff] }
 0x18b   : > { %v1554_v58 = vadd.f32 %v1520_v39, %v1378_v53  ;;  %v3541_v59 = vrot.slane %v2087_v18, %v2095_v25  ;;  %v1734_v9 = vadd.f32 %v3479_v34, %v1556_v4  ;;  %v1559_v18 = vadd.f32 %v3492_v27, %v1383_v2 }
 0x18c   : > { %v1878_v56 = vpop.f32.mrf.mxu1  ;;  %v2036_v51 = vpop.f32.mrf.mxu0  ;;  %v1735_v12 = vadd.f32 %v3483_v46, %v1557_v26  ;;  %v1736_v16 = vadd.f32 %v3677_v42, %v1558_v40  ;;  %v3678_v46 = vld [vmem:[#allocation12_spill] sm:$0xff] }
 0x18d   : > { %v1915_v31 = vadd.f32 %v1878_v56, %v1729_v61  ;;  %v1732_v39 = vadd.f32 %v3473_v38, %v1554_v58  ;;  %v1229_v56 = vadd.f32 %v3674_v60, %v3419_v50  ;;  %v1737_v19 = vadd.f32 %v3680_v48, %v1559_v18  ;;  %v3688_v60 = vld [vmem:[#allocation16_spill] sm:$0xff] }
 0x18e   : > { %v1880_v24 = vpop.f32.mrf.mxu1  ;;  %v2038_v36 = vpop.f32.mrf.mxu0 }
 0x18f   : > { %v2073_v21 = vadd.f32 %v2036_v51, %v1915_v31  ;;  %v1916_v3 = vadd.f32 %v1880_v24, %v1730_v57  ;;  %v3676_v51 = vld [vmem:[#allocation8_spill] sm:$0xff]  ;;  %v1560_v31 = vadd.f32 %v3678_v46, %v1384_v7 }
 0x190   : > { %v1882_v55 = vpop.f32.mrf.mxu1  ;;  %v2040_v5 = vpop.f32.mrf.mxu0  ;;  %v1230_v14 = vadd.f32 %v3676_v51, %v3675_v15 }
 0x191   : > { %v2099_v37 = vadd.f32 %v3536_v30, %v2073_v21  ;;  %v2074_v41 = vadd.f32 %v2038_v36, %v1916_v3  ;;  %v1917_v53 = vadd.f32 %v1882_v55, %v1731_v29  ;;  %v3679_v36 = vld [vmem:[#allocation14_spill] sm:$0xff] }
 0x192   : > { %v1884_v33 = vpop.f32.mrf.mxu1  ;;  %v2042_v47 = vpop.f32.mrf.mxu0  ;;  %v1561_v29 = vadd.f32 %v3679_v36, %v1385_v43 }
 0x193   : > { %v2100_v38 = vadd.f32 %v3541_v59, %v2074_v41  ;;  %v2075_v25 = vadd.f32 %v2040_v5, %v1917_v53  ;;  %v1918_v62 = vadd.f32 %v1884_v33, %v1732_v39  ;;  %v2113_v13 = vmax.f32 %v2099_v37, 0.0  ;;  %v3681_v5 = vld [vmem:[#allocation5_spill] sm:$0xff]  ;;  %v3682_v37 = vld [vmem:[#allocation7_spill] sm:$0xff] }
 0x194   : > { %v1888_v44 = vpop.f32.mrf.mxu1  ;;  %v2046_v8 = vpop.f32.mrf.mxu0  ;;  %v1386_v39 = vadd.f32 %v3681_v5, %v1228_v6  ;;  %v1387_v41 = vadd.f32 %v3682_v37, %v1229_v56  ;;  %v3683_v53 = vld [vmem:[#allocation9_spill] sm:$0xff]  ;;  %v3687_v6 = vld [vmem:[#allocation19_spill] sm:$0xff] }
 0x195   : > { %v2114_v49 = vmax.f32 %v2100_v38, 0.0  ;;  %v2101_v35 = vadd.f32 %v3536_v30, %v2075_v25  ;;  %v2076_v28 = vadd.f32 %v2042_v47, %v1918_v62  ;;  %v1919_v45 = vadd.f32 %v1888_v44, %v1733_v11  ;;  %v3684_v33 = vld [vmem:[#allocation13_spill] sm:$0xff]  ;;  %v3685_v62 = vld [vmem:[#allocation15_spill] sm:$0xff] }
 0x196   : > { %v1890_v54 = vpop.f32.mrf.mxu1  ;;  %v2048_v52 = vpop.f32.mrf.mxu0  ;;  %v1388_v22 = vadd.f32 %v3683_v53, %v1230_v14  ;;  %v1738_v47 = vadd.f32 %v3684_v33, %v1560_v31  ;;  %v1739_v2 = vadd.f32 %v3685_v62, %v1561_v29  ;;  %v1562_v7 = vadd.f32 %v3506_v17, %v1386_v39  ;;  %v3689_v14 = vld [vmem:[#allocation18_spill] sm:$0xff] }
 0x197   : > { %v2550_v61 = vpack.c.bf16 %v2114_v49, %v2113_v13  ;;  %v2102_v20 = vadd.f32 %v3541_v59, %v2076_v28  ;;  %v2077_v10 = vadd.f32 %v2046_v8, %v1919_v45  ;;  %v1920_v57 = vadd.f32 %v1890_v54, %v1734_v9  ;;  %v3686_v49 = vld [vmem:[#allocation17_spill] sm:$0xff] }
 0x198   : > { %v1892_v34 = vpop.f32.mrf.mxu1  ;;  %v2050_v58 = vpop.f32.mrf.mxu0  ;;  %v2115_v27 = vmax.f32 %v2101_v35, 0.0  ;;  %v1563_v35 = vadd.f32 %v3686_v49, %v1387_v41  ;;  %v1564_v9 = vadd.f32 %v3687_v6, %v1388_v22  ;;  %v1740_v56 = vadd.f32 %v3688_v60, %v1562_v7 }
 0x199   : > { %2171 = vst [vmem:[%s3579_s11] sm:$0xff] %v2550_v61  ;;  %v2116_v23 = vmax.f32 %v2102_v20, 0.0  ;;  %v1921_v24 = vadd.f32 %v1892_v34, %v1735_v12  ;;  %v2103_v50 = vadd.f32 %v3536_v30, %v2077_v10  ;;  %v2078_v0 = vadd.f32 %v2048_v52, %v1920_v57 }
 0x19a   : > { %v1894_v21 = vpop.f32.mrf.mxu1  ;;  %v2052_v3 = vpop.f32.mrf.mxu0  ;;  %v1741_v42 = vadd.f32 %v3689_v14, %v1563_v35 }
 0x19b   : > { %v2551_v63 = vpack.c.bf16 %v2116_v23, %v2115_v27  ;;  %v2079_v32 = vadd.f32 %v2050_v58, %v1921_v24  ;;  %v1922_v55 = vadd.f32 %v1894_v21, %v1736_v16  ;;  %v2104_v1 = vadd.f32 %v3541_v59, %v2078_v0  ;;  %v3690_v27 = vld [vmem:[#allocation20_spill] sm:$0xff] }
 0x19c   : > { %v1898_v4 = vpop.f32.mrf.mxu1  ;;  %v2056_v26 = vpop.f32.mrf.mxu0  ;;  %v2117_v40 = vmax.f32 %v2103_v50, 0.0  ;;  %v1742_v23 = vadd.f32 %v3690_v27, %v1564_v9 }
 0x19d   : > { %2172 = vst [vmem:[%s3579_s11 + $0x8] sm:$0xff] %v2551_v63  ;;  %v2105_v11 = vadd.f32 %v3536_v30, %v2079_v32  ;;  %v2080_v38 = vadd.f32 %v2052_v3, %v1922_v55  ;;  %v1923_v25 = vadd.f32 %v1898_v4, %v1737_v19  ;;  %v2118_v13 = vmax.f32 %v2104_v1, 0.0 }
 0x19e   : > { %v1900_v44 = vpop.f32.mrf.mxu1  ;;  %v2058_v8 = vpop.f32.mrf.mxu0 }
 0x19f   : > { %v2106_v28 = vadd.f32 %v3541_v59, %v2080_v38  ;;  %v2081_v45 = vadd.f32 %v2056_v26, %v1923_v25  ;;  %v1924_v43 = vadd.f32 %v1900_v44, %v1738_v47  ;;  %v2552_v12 = vpack.c.bf16 %v2118_v13, %v2117_v40 }
 0x1a0   : > { %v2119_v54 = vmax.f32 %v2105_v11, 0.0  ;;  %v1902_v52 = vpop.f32.mrf.mxu1  ;;  %v2060_v18 = vpop.f32.mrf.mxu0 }
 0x1a1   : > { %v2120_v61 = vmax.f32 %v2106_v28, 0.0  ;;  %v2107_v17 = vadd.f32 %v3536_v30, %v2081_v45  ;;  %v2082_v20 = vadd.f32 %v2058_v8, %v1924_v43  ;;  %v1925_v10 = vadd.f32 %v1902_v52, %v1739_v2  ;;  %2173 = vst [vmem:[%s3579_s11 + $0x10] sm:$0xff] %v2552_v12 }
 0x1a2   : > { %v1904_v15 = vpop.f32.mrf.mxu1  ;;  %v2062_v51 = vpop.f32.mrf.mxu0 }
 0x1a3   : > { %v2553_v16 = vpack.c.bf16 %v2120_v61, %v2119_v54  ;;  %v2108_v57 = vadd.f32 %v3541_v59, %v2082_v20  ;;  %v2083_v34 = vadd.f32 %v2060_v18, %v1925_v10  ;;  %v1926_v58 = vadd.f32 %v1904_v15, %v1740_v56 }
 0x1a4   : > { %v1908_v46 = vpop.f32.mrf.mxu1  ;;  %v2066_v31 = vpop.f32.mrf.mxu0  ;;  %v2121_v24 = vmax.f32 %v2107_v17, 0.0 }
 0x1a5   : > { %2174 = vst [vmem:[%s3579_s11 + $0x18] sm:$0xff] %v2553_v16  ;;  %v2122_v36 = vmax.f32 %v2108_v57, 0.0  ;;  %v1927_v29 = vadd.f32 %v1908_v46, %v1741_v42  ;;  %v2109_v50 = vadd.f32 %v3536_v30, %v2083_v34  ;;  %v2084_v0 = vadd.f32 %v2062_v51, %v1926_v58 }
 0x1a6   : > { %v1910_v21 = vpop.f32.mrf.mxu1  ;;  %v2068_v3 = vpop.f32.mrf.mxu0 }
 0x1a7   : > { %v2554_v48 = vpack.c.bf16 %v2122_v36, %v2121_v24  ;;  %v2085_v19 = vadd.f32 %v2066_v31, %v1927_v29  ;;  %v1928_v63 = vadd.f32 %v1910_v21, %v1742_v23  ;;  %v2110_v32 = vadd.f32 %v3541_v59, %v2084_v0 }
 0x1a8   : > { %v1912_v55 = vpop.f32.mrf.mxu1  ;;  %v2070_v5 = vpop.f32.mrf.mxu0  ;;  %v2123_v41 = vmax.f32 %v2109_v50, 0.0  ;;  %v2234_v38 = vld [vmem:[%s3579_s11 + $0x10] sm:$0xff] (%p2929_p9) }
 0x1a9   : > { %2175 = vst [vmem:[%s3579_s11 + $0x20] sm:$0xff] %v2554_v48  ;;  %v2111_v39 = vadd.f32 %v3536_v30, %v2085_v19  ;;  %v2086_v37 = vadd.f32 %v2068_v3, %v1928_v63  ;;  %v2124_v53 = vmax.f32 %v2110_v32, 0.0  ;;  %v2230_v30 = vld [vmem:[%s3579_s11] sm:$0xff] (%p2929_p9)  ;;  %2235 = vst [vmem:[%s2189_s28 + $0x20] sm:$0xff] (%p2929_p9), %v2234_v38 }
 0x1aa   : > { %v1913_v22 = vpop.f32.mrf.mxu1  ;;  %v2071_v1 = vpop.f32.mrf.mxu0  ;;  %2231 = vst [vmem:[%s2189_s28] sm:$0xff] (%p2929_p9), %v2230_v30 }
 0x1ab   : > { %v2112_v4 = vadd.f32 %v3541_v59, %v2086_v37  ;;  %v2555_v26 = vpack.c.bf16 %v2124_v53, %v2123_v41  ;;  %v2125_v33 = vmax.f32 %v2111_v39, 0.0  ;;  %v2232_v59 = vld [vmem:[%s3579_s11 + $0x8] sm:$0xff] (%p2929_p9) }
 0x1ac   : > { %v2236_v25 = vld [vmem:[%s3579_s11 + $0x18] sm:$0xff] (%p2929_p9)  ;;  %2233 = vst [vmem:[%s2189_s28 + $0x10] sm:$0xff] (%p2929_p9), %v2232_v59 }
 0x1ad   : > { %v2126_v47 = vmax.f32 %v2112_v4, 0.0  ;;  %2176 = vst [vmem:[%s3579_s11 + $0x28] sm:$0xff] %v2555_v26  ;;  %2184 = sbr.rel (!%p2929_p9) target bundleno = 442 (0x1ba), region = 74  ;;  %2237 = vst [vmem:[%s2189_s28 + $0x30] sm:$0xff] (%p2929_p9), %v2236_v25 }
 0x1af   : > { %v2556_v11 = vpack.c.bf16 %v2126_v47, %v2125_v33 }
 0x1b0   : > { %v2238_v62 = vld [vmem:[%s3579_s11 + $0x20] sm:$0xff] (%p2929_p9) }
 0x1b1   : > { %2177 = vst [vmem:[%s3579_s11 + $0x30] sm:$0x33] %v2556_v11  ;;  %2239 = vst [vmem:[%s2189_s28 + $0x40] sm:$0xff] (%p2929_p9), %v2238_v62 }
 0x1b4   : > { %v2240_v2 = vld [vmem:[%s3579_s11 + $0x28] sm:$0xff] }
 0x1b5   : > { %2241 = vst [vmem:[%s2189_s28 + $0x50] sm:$0xff] %v2240_v2 }
 0x1b8   : > { %v2242_v7 = vld [vmem:[%s3579_s11 + $0x30] sm:$0xff] }
 0x1b9   : > { %2243 = vst [vmem:[%s2189_s28 + $0x60] sm:$0xff] %v2242_v7 }
 0x1ba PF: > { %s13_s20 = sadd.s32 1, %s2839_s20   ;;  %s3691_s12 = smov %s2811_s13 }
 0x1bb   : > { %p10_p2 = scmp.ge.s32.totalorder %s13_s20, 14   ;;  %s3692_s13 = smov %s2934_s4 }
 0x1bc   : > { %s3693_s14 = smov %s2819_s15  ;;  %s3694_s15 = smov %s2923_s27 }
 0x1bd   : > { %s3695_s16 = smov %s2831_s18  ;;  %s3696_s17 = smov %s2835_s19 }
 0x1be   : > { %s3697_s18 = smov %s3700_s22  ;;  %s3698_s19 = smov %s3704_s23 }
 0x1bf   :  { %12 = sbr.rel (!%p10_p2) target bundleno = 5 (0x5), region = 157 }

</bundles_post_ra>
